<compile_context>
chip_gen: v7x
topology: tpu7x:2x2x1
jax: 0.10.0
libtpu: 0.0.40
codegen_flags: <defaults>
</compile_context>

<pallas_src>
import jax
import jax.numpy as jnp
from jax import lax
from jax.experimental import pallas as pl
from jax.experimental.pallas import tpu as pltpu


def gru_regressor_kernel(x_ref,
                         wih_r_ref, wih_z_ref, wih_n_ref,
                         whh_r_ref, whh_z_ref, whh_n_ref,
                         b_r_ref, b_z_ref, b_ni_ref, b_nh_ref,
                         wfc_ref, bfc_ref,
                         out_ref):
    """GRU (gate order [r, z, n]) over T steps + Linear(H -> 1) on final hidden.

    x_ref    : (T*B, I)  time-major flattened input (row t*B + b = x[b, t, :])
    wih_*    : (I, H)    per-gate W_ih^T
    whh_*    : (H, H)    per-gate W_hh^T
    b_r, b_z : (1, H)    folded biases (b_ih + b_hh) for the r / z gates
    b_ni     : (1, H)    b_ih of the n gate
    b_nh     : (1, H)    b_hh of the n gate (must stay inside r * (...))
    wfc      : (1, H)    fc weight row
    bfc      : (1, 1)
    out_ref  : (B, 1)
    """
    B = out_ref.shape[0]
    TB, _ = x_ref.shape
    T = TB // B
    H = whh_r_ref.shape[0]

    x2d = x_ref[...]                                              # (T*B, I)

    # Hoisted input projection: one big matmul per gate, biases folded in.
    gx_r = jnp.dot(x2d, wih_r_ref[...],
                   preferred_element_type=jnp.float32) + b_r_ref[...]   # (T*B, H)
    gx_z = jnp.dot(x2d, wih_z_ref[...],
                   preferred_element_type=jnp.float32) + b_z_ref[...]
    gx_n = jnp.dot(x2d, wih_n_ref[...],
                   preferred_element_type=jnp.float32) + b_ni_ref[...]

    whh_r = whh_r_ref[...]
    whh_z = whh_z_ref[...]
    whh_n = whh_n_ref[...]
    b_nh = b_nh_ref[...]

    h = jnp.zeros((B, H), dtype=jnp.float32)
    # T is small and static: fully unrolled recurrence, all slices static and
    # sublane-aligned (B is a multiple of 8).
    for t in range(T):
        lo = t * B
        gh_r = jnp.dot(h, whh_r, preferred_element_type=jnp.float32)
        gh_z = jnp.dot(h, whh_z, preferred_element_type=jnp.float32)
        gh_n = jnp.dot(h, whh_n, preferred_element_type=jnp.float32) + b_nh
        r = jax.nn.sigmoid(gx_r[lo:lo + B, :] + gh_r)
        z = jax.nn.sigmoid(gx_z[lo:lo + B, :] + gh_z)
        n = jnp.tanh(gx_n[lo:lo + B, :] + r * gh_n)
        h = (1.0 - z) * n + z * h

    # Final Linear(H -> 1): VPU multiply + lane reduction (keeps the epilogue
    # off the MXU).
    out_ref[...] = (jnp.sum(h * wfc_ref[...], axis=-1, keepdims=True)
                    + bfc_ref[...])                               # (B, 1)


def gru_regressor(x, kparams):
    """x: (B, T, I) float32. Returns (B, 1) float32."""
    B, T, I = x.shape
    H = kparams["whh_r"].shape[0]

    # Pad batch to a full f32 sublane tile (8 rows): free occupancy win.
    B_pad = max(8, ((B + 7) // 8) * 8)
    if B_pad != B:
        x = jnp.pad(x, ((0, B_pad - B), (0, 0), (0, 0)))

    # Time-major flatten in the wrapper (layout plumbing only, no compute).
    x_tm = jnp.transpose(x, (1, 0, 2)).reshape(T * B_pad, I)

    vmem = pl.BlockSpec(memory_space=pltpu.MemorySpace.VMEM)
    out = pl.pallas_call(
        gru_regressor_kernel,
        out_shape=jax.ShapeDtypeStruct((B_pad, 1), jnp.float32),
        in_specs=[vmem] * 13,
        out_specs=vmem,
    )(x_tm,
      kparams["wih_r"], kparams["wih_z"], kparams["wih_n"],
      kparams["whh_r"], kparams["whh_z"], kparams["whh_n"],
      kparams["b_r"], kparams["b_z"], kparams["b_ni"], kparams["b_nh"],
      kparams["wfc_row"], kparams["bfc"])
    return out[:B]


def init_params(key, input_size=4, hidden_size=64):
    """Deterministic PyTorch-style init: U(-1/sqrt(H), 1/sqrt(H)), gate order [r|z|n]."""
    k = 1.0 / jnp.sqrt(jnp.float32(hidden_size))
    keys = jax.random.split(key, 6)
    u = lambda kk, shape: jax.random.uniform(kk, shape, jnp.float32, -k, k)
    return {
        "w_ih": u(keys[0], (3 * hidden_size, input_size)),
        "w_hh": u(keys[1], (3 * hidden_size, hidden_size)),
        "b_ih": u(keys[2], (3 * hidden_size,)),
        "b_hh": u(keys[3], (3 * hidden_size,)),
        "w_fc": u(keys[4], (1, hidden_size)),
        "b_fc": u(keys[5], (1,)),
    }


def prepare_kernel_params(p):
    """Split per gate, transpose, and pre-fold biases for the kernel layout."""
    H = p["w_hh"].shape[1]
    wih_r, wih_z, wih_n = p["w_ih"][:H], p["w_ih"][H:2 * H], p["w_ih"][2 * H:]
    whh_r, whh_z, whh_n = p["w_hh"][:H], p["w_hh"][H:2 * H], p["w_hh"][2 * H:]
    bih_r, bih_z, bih_n = p["b_ih"][:H], p["b_ih"][H:2 * H], p["b_ih"][2 * H:]
    bhh_r, bhh_z, bhh_n = p["b_hh"][:H], p["b_hh"][H:2 * H], p["b_hh"][2 * H:]
    row = lambda v: v.reshape(1, -1)
    return {
        "wih_r": wih_r.T, "wih_z": wih_z.T, "wih_n": wih_n.T,    # (I, H)
        "whh_r": whh_r.T, "whh_z": whh_z.T, "whh_n": whh_n.T,    # (H, H)
        "b_r": row(bih_r + bhh_r),   # folded (added outside the recurrence)
        "b_z": row(bih_z + bhh_z),
        "b_ni": row(bih_n),
        "b_nh": row(bhh_n),          # stays inside r * (W_hn h + b_hn)
        "wfc_row": p["w_fc"],        # (1, H)
        "bfc": p["b_fc"].reshape(1, 1),
    }


def reference(x, p):
    """Pure-JAX reference of the PyTorch forward (sanity check)."""
    H = p["w_hh"].shape[1]
    wih_t, whh_t = p["w_ih"].T, p["w_hh"].T
    bih, bhh = p["b_ih"].reshape(1, -1), p["b_hh"].reshape(1, -1)

    def step(h, x_t):
        gx = x_t @ wih_t + bih
        gh = h @ whh_t + bhh
        r = jax.nn.sigmoid(gx[:, :H] + gh[:, :H])
        z = jax.nn.sigmoid(gx[:, H:2 * H] + gh[:, H:2 * H])
        n = jnp.tanh(gx[:, 2 * H:] + r * gh[:, 2 * H:])
        return (1.0 - z) * n + z * h, None

    h0 = jnp.zeros((x.shape[0], H), dtype=jnp.float32)
    h_n, _ = lax.scan(step, h0, jnp.swapaxes(x, 0, 1))
    return h_n @ p["w_fc"].T + p["b_fc"].reshape(1, 1)


if __name__ == "__main__":
    B, T, I, H = 2, 8, 4, 64
    key = jax.random.PRNGKey(0)
    k_x, k_p = jax.random.split(key)
    x = jax.random.normal(k_x, (B, T, I), dtype=jnp.float32)
    params = init_params(k_p, input_size=I, hidden_size=H)
    kparams = prepare_kernel_params(params)

    out = gru_regressor(x, kparams)
    out = jax.block_until_ready(out)

    ref = reference(x, params)
    assert out.shape == (B, 1)
    assert jnp.allclose(out, ref, atol=1e-4, rtol=1e-4), (out, ref)
    print("KERNEL_OK")
</pallas_src>

<mosaic_0001>
module attributes {stable_mosaic.version = 11 : i64} {
  func.func @gru_regressor_kernel(%arg0: memref<64x4xf32, #tpu.memory_space<vmem>>, %arg1: memref<4x64xf32, #tpu.memory_space<vmem>>, %arg2: memref<4x64xf32, #tpu.memory_space<vmem>>, %arg3: memref<4x64xf32, #tpu.memory_space<vmem>>, %arg4: memref<64x64xf32, #tpu.memory_space<vmem>>, %arg5: memref<64x64xf32, #tpu.memory_space<vmem>>, %arg6: memref<64x64xf32, #tpu.memory_space<vmem>>, %arg7: memref<1x64xf32, #tpu.memory_space<vmem>>, %arg8: memref<1x64xf32, #tpu.memory_space<vmem>>, %arg9: memref<1x64xf32, #tpu.memory_space<vmem>>, %arg10: memref<1x64xf32, #tpu.memory_space<vmem>>, %arg11: memref<1x64xf32, #tpu.memory_space<vmem>>, %arg12: memref<1x1xf32, #tpu.memory_space<vmem>>, %arg13: memref<8x1xf32, #tpu.memory_space<vmem>>) attributes {dimension_semantics = [], scalar_prefetch = 0 : i64, scratch_operands = 0 : i64, tpu.core_type = #tpu.core_type<tc>} {
    %c0 = arith.constant 0 : index
    %c0_0 = arith.constant 0 : index
    %0 = vector.load %arg0[%c0, %c0_0] : memref<64x4xf32, #tpu.memory_space<vmem>>, vector<64x4xf32>
    %c0_1 = arith.constant 0 : index
    %c0_2 = arith.constant 0 : index
    %1 = vector.load %arg1[%c0_1, %c0_2] : memref<4x64xf32, #tpu.memory_space<vmem>>, vector<4x64xf32>
    %cst = arith.constant dense<0.000000e+00> : vector<64x64xf32>
    %2 = tpu.matmul %0, %1, %cst {dimension_numbers = #tpu.dot_dimension_numbers<[1], [0], [0], [1], [0, 0, 1, 1], [], []>} : vector<64x4xf32>, vector<4x64xf32>, vector<64x64xf32> -> vector<64x64xf32>
    %c0_3 = arith.constant 0 : index
    %c0_4 = arith.constant 0 : index
    %3 = vector.load %arg7[%c0_3, %c0_4] : memref<1x64xf32, #tpu.memory_space<vmem>>, vector<1x64xf32>
    %4 = vector.broadcast %3 : vector<1x64xf32> to vector<64x64xf32>
    %5 = arith.addf %2, %4 : vector<64x64xf32>
    %c0_5 = arith.constant 0 : index
    %c0_6 = arith.constant 0 : index
    %6 = vector.load %arg2[%c0_5, %c0_6] : memref<4x64xf32, #tpu.memory_space<vmem>>, vector<4x64xf32>
    %cst_7 = arith.constant dense<0.000000e+00> : vector<64x64xf32>
    %7 = tpu.matmul %0, %6, %cst_7 {dimension_numbers = #tpu.dot_dimension_numbers<[1], [0], [0], [1], [0, 0, 1, 1], [], []>} : vector<64x4xf32>, vector<4x64xf32>, vector<64x64xf32> -> vector<64x64xf32>
    %c0_8 = arith.constant 0 : index
    %c0_9 = arith.constant 0 : index
    %8 = vector.load %arg8[%c0_8, %c0_9] : memref<1x64xf32, #tpu.memory_space<vmem>>, vector<1x64xf32>
    %9 = vector.broadcast %8 : vector<1x64xf32> to vector<64x64xf32>
    %10 = arith.addf %7, %9 : vector<64x64xf32>
    %c0_10 = arith.constant 0 : index
    %c0_11 = arith.constant 0 : index
    %11 = vector.load %arg3[%c0_10, %c0_11] : memref<4x64xf32, #tpu.memory_space<vmem>>, vector<4x64xf32>
    %cst_12 = arith.constant dense<0.000000e+00> : vector<64x64xf32>
    %12 = tpu.matmul %0, %11, %cst_12 {dimension_numbers = #tpu.dot_dimension_numbers<[1], [0], [0], [1], [0, 0, 1, 1], [], []>} : vector<64x4xf32>, vector<4x64xf32>, vector<64x64xf32> -> vector<64x64xf32>
    %c0_13 = arith.constant 0 : index
    %c0_14 = arith.constant 0 : index
    %13 = vector.load %arg9[%c0_13, %c0_14] : memref<1x64xf32, #tpu.memory_space<vmem>>, vector<1x64xf32>
    %14 = vector.broadcast %13 : vector<1x64xf32> to vector<64x64xf32>
    %15 = arith.addf %12, %14 : vector<64x64xf32>
    %c0_15 = arith.constant 0 : index
    %c0_16 = arith.constant 0 : index
    %16 = vector.load %arg4[%c0_15, %c0_16] : memref<64x64xf32, #tpu.memory_space<vmem>>, vector<64x64xf32>
    %c0_17 = arith.constant 0 : index
    %c0_18 = arith.constant 0 : index
    %17 = vector.load %arg5[%c0_17, %c0_18] : memref<64x64xf32, #tpu.memory_space<vmem>>, vector<64x64xf32>
    %c0_19 = arith.constant 0 : index
    %c0_20 = arith.constant 0 : index
    %18 = vector.load %arg6[%c0_19, %c0_20] : memref<64x64xf32, #tpu.memory_space<vmem>>, vector<64x64xf32>
    %c0_21 = arith.constant 0 : index
    %c0_22 = arith.constant 0 : index
    %19 = vector.load %arg10[%c0_21, %c0_22] : memref<1x64xf32, #tpu.memory_space<vmem>>, vector<1x64xf32>
    %cst_23 = arith.constant 0.000000e+00 : f32
    %20 = vector.broadcast %cst_23 : f32 to vector<8x64xf32>
    %cst_24 = arith.constant dense<0.000000e+00> : vector<8x64xf32>
    %21 = tpu.matmul %20, %16, %cst_24 {dimension_numbers = #tpu.dot_dimension_numbers<[1], [0], [0], [1], [0, 0, 1, 1], [], []>} : vector<8x64xf32>, vector<64x64xf32>, vector<8x64xf32> -> vector<8x64xf32>
    %cst_25 = arith.constant dense<0.000000e+00> : vector<8x64xf32>
    %22 = tpu.matmul %20, %17, %cst_25 {dimension_numbers = #tpu.dot_dimension_numbers<[1], [0], [0], [1], [0, 0, 1, 1], [], []>} : vector<8x64xf32>, vector<64x64xf32>, vector<8x64xf32> -> vector<8x64xf32>
    %cst_26 = arith.constant dense<0.000000e+00> : vector<8x64xf32>
    %23 = tpu.matmul %20, %18, %cst_26 {dimension_numbers = #tpu.dot_dimension_numbers<[1], [0], [0], [1], [0, 0, 1, 1], [], []>} : vector<8x64xf32>, vector<64x64xf32>, vector<8x64xf32> -> vector<8x64xf32>
    %24 = vector.broadcast %19 : vector<1x64xf32> to vector<8x64xf32>
    %25 = arith.addf %23, %24 : vector<8x64xf32>
    %26 = vector.extract_strided_slice %5 {offsets = [0, 0], sizes = [8, 64], strides = [1, 1]} : vector<64x64xf32> to vector<8x64xf32>
    %27 = arith.addf %26, %21 : vector<8x64xf32>
    %28 = arith.negf %27 : vector<8x64xf32>
    %29 = math.exp %28 : vector<8x64xf32>
    %cst_27 = arith.constant 1.000000e+00 : f32
    %30 = vector.broadcast %cst_27 : f32 to vector<8x64xf32>
    %31 = arith.addf %30, %29 : vector<8x64xf32>
    %32 = arith.divf %30, %31 : vector<8x64xf32>
    %33 = vector.extract_strided_slice %10 {offsets = [0, 0], sizes = [8, 64], strides = [1, 1]} : vector<64x64xf32> to vector<8x64xf32>
    %34 = arith.addf %33, %22 : vector<8x64xf32>
    %35 = arith.negf %34 : vector<8x64xf32>
    %36 = math.exp %35 : vector<8x64xf32>
    %cst_28 = arith.constant 1.000000e+00 : f32
    %37 = vector.broadcast %cst_28 : f32 to vector<8x64xf32>
    %38 = arith.addf %37, %36 : vector<8x64xf32>
    %39 = arith.divf %37, %38 : vector<8x64xf32>
    %40 = vector.extract_strided_slice %15 {offsets = [0, 0], sizes = [8, 64], strides = [1, 1]} : vector<64x64xf32> to vector<8x64xf32>
    %41 = arith.mulf %32, %25 : vector<8x64xf32>
    %42 = arith.addf %40, %41 : vector<8x64xf32>
    %43 = math.tanh %42 : vector<8x64xf32>
    %cst_29 = arith.constant 1.000000e+00 : f32
    %44 = vector.broadcast %cst_29 : f32 to vector<8x64xf32>
    %45 = arith.subf %44, %39 : vector<8x64xf32>
    %46 = arith.mulf %45, %43 : vector<8x64xf32>
    %47 = arith.mulf %39, %20 : vector<8x64xf32>
    %48 = arith.addf %46, %47 : vector<8x64xf32>
    %cst_30 = arith.constant dense<0.000000e+00> : vector<8x64xf32>
    %49 = tpu.matmul %48, %16, %cst_30 {dimension_numbers = #tpu.dot_dimension_numbers<[1], [0], [0], [1], [0, 0, 1, 1], [], []>} : vector<8x64xf32>, vector<64x64xf32>, vector<8x64xf32> -> vector<8x64xf32>
    %cst_31 = arith.constant dense<0.000000e+00> : vector<8x64xf32>
    %50 = tpu.matmul %48, %17, %cst_31 {dimension_numbers = #tpu.dot_dimension_numbers<[1], [0], [0], [1], [0, 0, 1, 1], [], []>} : vector<8x64xf32>, vector<64x64xf32>, vector<8x64xf32> -> vector<8x64xf32>
    %cst_32 = arith.constant dense<0.000000e+00> : vector<8x64xf32>
    %51 = tpu.matmul %48, %18, %cst_32 {dimension_numbers = #tpu.dot_dimension_numbers<[1], [0], [0], [1], [0, 0, 1, 1], [], []>} : vector<8x64xf32>, vector<64x64xf32>, vector<8x64xf32> -> vector<8x64xf32>
    %52 = vector.broadcast %19 : vector<1x64xf32> to vector<8x64xf32>
    %53 = arith.addf %51, %52 : vector<8x64xf32>
    %54 = vector.extract_strided_slice %5 {offsets = [8, 0], sizes = [8, 64], strides = [1, 1]} : vector<64x64xf32> to vector<8x64xf32>
    %55 = arith.addf %54, %49 : vector<8x64xf32>
    %56 = arith.negf %55 : vector<8x64xf32>
    %57 = math.exp %56 : vector<8x64xf32>
    %cst_33 = arith.constant 1.000000e+00 : f32
    %58 = vector.broadcast %cst_33 : f32 to vector<8x64xf32>
    %59 = arith.addf %58, %57 : vector<8x64xf32>
    %60 = arith.divf %58, %59 : vector<8x64xf32>
    %61 = vector.extract_strided_slice %10 {offsets = [8, 0], sizes = [8, 64], strides = [1, 1]} : vector<64x64xf32> to vector<8x64xf32>
    %62 = arith.addf %61, %50 : vector<8x64xf32>
    %63 = arith.negf %62 : vector<8x64xf32>
    %64 = math.exp %63 : vector<8x64xf32>
    %cst_34 = arith.constant 1.000000e+00 : f32
    %65 = vector.broadcast %cst_34 : f32 to vector<8x64xf32>
    %66 = arith.addf %65, %64 : vector<8x64xf32>
    %67 = arith.divf %65, %66 : vector<8x64xf32>
    %68 = vector.extract_strided_slice %15 {offsets = [8, 0], sizes = [8, 64], strides = [1, 1]} : vector<64x64xf32> to vector<8x64xf32>
    %69 = arith.mulf %60, %53 : vector<8x64xf32>
    %70 = arith.addf %68, %69 : vector<8x64xf32>
    %71 = math.tanh %70 : vector<8x64xf32>
    %cst_35 = arith.constant 1.000000e+00 : f32
    %72 = vector.broadcast %cst_35 : f32 to vector<8x64xf32>
    %73 = arith.subf %72, %67 : vector<8x64xf32>
    %74 = arith.mulf %73, %71 : vector<8x64xf32>
    %75 = arith.mulf %67, %48 : vector<8x64xf32>
    %76 = arith.addf %74, %75 : vector<8x64xf32>
    %cst_36 = arith.constant dense<0.000000e+00> : vector<8x64xf32>
    %77 = tpu.matmul %76, %16, %cst_36 {dimension_numbers = #tpu.dot_dimension_numbers<[1], [0], [0], [1], [0, 0, 1, 1], [], []>} : vector<8x64xf32>, vector<64x64xf32>, vector<8x64xf32> -> vector<8x64xf32>
    %cst_37 = arith.constant dense<0.000000e+00> : vector<8x64xf32>
    %78 = tpu.matmul %76, %17, %cst_37 {dimension_numbers = #tpu.dot_dimension_numbers<[1], [0], [0], [1], [0, 0, 1, 1], [], []>} : vector<8x64xf32>, vector<64x64xf32>, vector<8x64xf32> -> vector<8x64xf32>
    %cst_38 = arith.constant dense<0.000000e+00> : vector<8x64xf32>
    %79 = tpu.matmul %76, %18, %cst_38 {dimension_numbers = #tpu.dot_dimension_numbers<[1], [0], [0], [1], [0, 0, 1, 1], [], []>} : vector<8x64xf32>, vector<64x64xf32>, vector<8x64xf32> -> vector<8x64xf32>
    %80 = vector.broadcast %19 : vector<1x64xf32> to vector<8x64xf32>
    %81 = arith.addf %79, %80 : vector<8x64xf32>
    %82 = vector.extract_strided_slice %5 {offsets = [16, 0], sizes = [8, 64], strides = [1, 1]} : vector<64x64xf32> to vector<8x64xf32>
    %83 = arith.addf %82, %77 : vector<8x64xf32>
    %84 = arith.negf %83 : vector<8x64xf32>
    %85 = math.exp %84 : vector<8x64xf32>
    %cst_39 = arith.constant 1.000000e+00 : f32
    %86 = vector.broadcast %cst_39 : f32 to vector<8x64xf32>
    %87 = arith.addf %86, %85 : vector<8x64xf32>
    %88 = arith.divf %86, %87 : vector<8x64xf32>
    %89 = vector.extract_strided_slice %10 {offsets = [16, 0], sizes = [8, 64], strides = [1, 1]} : vector<64x64xf32> to vector<8x64xf32>
    %90 = arith.addf %89, %78 : vector<8x64xf32>
    %91 = arith.negf %90 : vector<8x64xf32>
    %92 = math.exp %91 : vector<8x64xf32>
    %cst_40 = arith.constant 1.000000e+00 : f32
    %93 = vector.broadcast %cst_40 : f32 to vector<8x64xf32>
    %94 = arith.addf %93, %92 : vector<8x64xf32>
    %95 = arith.divf %93, %94 : vector<8x64xf32>
    %96 = vector.extract_strided_slice %15 {offsets = [16, 0], sizes = [8, 64], strides = [1, 1]} : vector<64x64xf32> to vector<8x64xf32>
    %97 = arith.mulf %88, %81 : vector<8x64xf32>
    %98 = arith.addf %96, %97 : vector<8x64xf32>
    %99 = math.tanh %98 : vector<8x64xf32>
    %cst_41 = arith.constant 1.000000e+00 : f32
    %100 = vector.broadcast %cst_41 : f32 to vector<8x64xf32>
    %101 = arith.subf %100, %95 : vector<8x64xf32>
    %102 = arith.mulf %101, %99 : vector<8x64xf32>
    %103 = arith.mulf %95, %76 : vector<8x64xf32>
    %104 = arith.addf %102, %103 : vector<8x64xf32>
    %cst_42 = arith.constant dense<0.000000e+00> : vector<8x64xf32>
    %105 = tpu.matmul %104, %16, %cst_42 {dimension_numbers = #tpu.dot_dimension_numbers<[1], [0], [0], [1], [0, 0, 1, 1], [], []>} : vector<8x64xf32>, vector<64x64xf32>, vector<8x64xf32> -> vector<8x64xf32>
    %cst_43 = arith.constant dense<0.000000e+00> : vector<8x64xf32>
    %106 = tpu.matmul %104, %17, %cst_43 {dimension_numbers = #tpu.dot_dimension_numbers<[1], [0], [0], [1], [0, 0, 1, 1], [], []>} : vector<8x64xf32>, vector<64x64xf32>, vector<8x64xf32> -> vector<8x64xf32>
    %cst_44 = arith.constant dense<0.000000e+00> : vector<8x64xf32>
    %107 = tpu.matmul %104, %18, %cst_44 {dimension_numbers = #tpu.dot_dimension_numbers<[1], [0], [0], [1], [0, 0, 1, 1], [], []>} : vector<8x64xf32>, vector<64x64xf32>, vector<8x64xf32> -> vector<8x64xf32>
    %108 = vector.broadcast %19 : vector<1x64xf32> to vector<8x64xf32>
    %109 = arith.addf %107, %108 : vector<8x64xf32>
    %110 = vector.extract_strided_slice %5 {offsets = [24, 0], sizes = [8, 64], strides = [1, 1]} : vector<64x64xf32> to vector<8x64xf32>
    %111 = arith.addf %110, %105 : vector<8x64xf32>
    %112 = arith.negf %111 : vector<8x64xf32>
    %113 = math.exp %112 : vector<8x64xf32>
    %cst_45 = arith.constant 1.000000e+00 : f32
    %114 = vector.broadcast %cst_45 : f32 to vector<8x64xf32>
    %115 = arith.addf %114, %113 : vector<8x64xf32>
    %116 = arith.divf %114, %115 : vector<8x64xf32>
    %117 = vector.extract_strided_slice %10 {offsets = [24, 0], sizes = [8, 64], strides = [1, 1]} : vector<64x64xf32> to vector<8x64xf32>
    %118 = arith.addf %117, %106 : vector<8x64xf32>
    %119 = arith.negf %118 : vector<8x64xf32>
    %120 = math.exp %119 : vector<8x64xf32>
    %cst_46 = arith.constant 1.000000e+00 : f32
    %121 = vector.broadcast %cst_46 : f32 to vector<8x64xf32>
    %122 = arith.addf %121, %120 : vector<8x64xf32>
    %123 = arith.divf %121, %122 : vector<8x64xf32>
    %124 = vector.extract_strided_slice %15 {offsets = [24, 0], sizes = [8, 64], strides = [1, 1]} : vector<64x64xf32> to vector<8x64xf32>
    %125 = arith.mulf %116, %109 : vector<8x64xf32>
    %126 = arith.addf %124, %125 : vector<8x64xf32>
    %127 = math.tanh %126 : vector<8x64xf32>
    %cst_47 = arith.constant 1.000000e+00 : f32
    %128 = vector.broadcast %cst_47 : f32 to vector<8x64xf32>
    %129 = arith.subf %128, %123 : vector<8x64xf32>
    %130 = arith.mulf %129, %127 : vector<8x64xf32>
    %131 = arith.mulf %123, %104 : vector<8x64xf32>
    %132 = arith.addf %130, %131 : vector<8x64xf32>
    %cst_48 = arith.constant dense<0.000000e+00> : vector<8x64xf32>
    %133 = tpu.matmul %132, %16, %cst_48 {dimension_numbers = #tpu.dot_dimension_numbers<[1], [0], [0], [1], [0, 0, 1, 1], [], []>} : vector<8x64xf32>, vector<64x64xf32>, vector<8x64xf32> -> vector<8x64xf32>
    %cst_49 = arith.constant dense<0.000000e+00> : vector<8x64xf32>
    %134 = tpu.matmul %132, %17, %cst_49 {dimension_numbers = #tpu.dot_dimension_numbers<[1], [0], [0], [1], [0, 0, 1, 1], [], []>} : vector<8x64xf32>, vector<64x64xf32>, vector<8x64xf32> -> vector<8x64xf32>
    %cst_50 = arith.constant dense<0.000000e+00> : vector<8x64xf32>
    %135 = tpu.matmul %132, %18, %cst_50 {dimension_numbers = #tpu.dot_dimension_numbers<[1], [0], [0], [1], [0, 0, 1, 1], [], []>} : vector<8x64xf32>, vector<64x64xf32>, vector<8x64xf32> -> vector<8x64xf32>
    %136 = vector.broadcast %19 : vector<1x64xf32> to vector<8x64xf32>
    %137 = arith.addf %135, %136 : vector<8x64xf32>
    %138 = vector.extract_strided_slice %5 {offsets = [32, 0], sizes = [8, 64], strides = [1, 1]} : vector<64x64xf32> to vector<8x64xf32>
    %139 = arith.addf %138, %133 : vector<8x64xf32>
    %140 = arith.negf %139 : vector<8x64xf32>
    %141 = math.exp %140 : vector<8x64xf32>
    %cst_51 = arith.constant 1.000000e+00 : f32
    %142 = vector.broadcast %cst_51 : f32 to vector<8x64xf32>
    %143 = arith.addf %142, %141 : vector<8x64xf32>
    %144 = arith.divf %142, %143 : vector<8x64xf32>
    %145 = vector.extract_strided_slice %10 {offsets = [32, 0], sizes = [8, 64], strides = [1, 1]} : vector<64x64xf32> to vector<8x64xf32>
    %146 = arith.addf %145, %134 : vector<8x64xf32>
    %147 = arith.negf %146 : vector<8x64xf32>
    %148 = math.exp %147 : vector<8x64xf32>
    %cst_52 = arith.constant 1.000000e+00 : f32
    %149 = vector.broadcast %cst_52 : f32 to vector<8x64xf32>
    %150 = arith.addf %149, %148 : vector<8x64xf32>
    %151 = arith.divf %149, %150 : vector<8x64xf32>
    %152 = vector.extract_strided_slice %15 {offsets = [32, 0], sizes = [8, 64], strides = [1, 1]} : vector<64x64xf32> to vector<8x64xf32>
    %153 = arith.mulf %144, %137 : vector<8x64xf32>
    %154 = arith.addf %152, %153 : vector<8x64xf32>
    %155 = math.tanh %154 : vector<8x64xf32>
    %cst_53 = arith.constant 1.000000e+00 : f32
    %156 = vector.broadcast %cst_53 : f32 to vector<8x64xf32>
    %157 = arith.subf %156, %151 : vector<8x64xf32>
    %158 = arith.mulf %157, %155 : vector<8x64xf32>
    %159 = arith.mulf %151, %132 : vector<8x64xf32>
    %160 = arith.addf %158, %159 : vector<8x64xf32>
    %cst_54 = arith.constant dense<0.000000e+00> : vector<8x64xf32>
    %161 = tpu.matmul %160, %16, %cst_54 {dimension_numbers = #tpu.dot_dimension_numbers<[1], [0], [0], [1], [0, 0, 1, 1], [], []>} : vector<8x64xf32>, vector<64x64xf32>, vector<8x64xf32> -> vector<8x64xf32>
    %cst_55 = arith.constant dense<0.000000e+00> : vector<8x64xf32>
    %162 = tpu.matmul %160, %17, %cst_55 {dimension_numbers = #tpu.dot_dimension_numbers<[1], [0], [0], [1], [0, 0, 1, 1], [], []>} : vector<8x64xf32>, vector<64x64xf32>, vector<8x64xf32> -> vector<8x64xf32>
    %cst_56 = arith.constant dense<0.000000e+00> : vector<8x64xf32>
    %163 = tpu.matmul %160, %18, %cst_56 {dimension_numbers = #tpu.dot_dimension_numbers<[1], [0], [0], [1], [0, 0, 1, 1], [], []>} : vector<8x64xf32>, vector<64x64xf32>, vector<8x64xf32> -> vector<8x64xf32>
    %164 = vector.broadcast %19 : vector<1x64xf32> to vector<8x64xf32>
    %165 = arith.addf %163, %164 : vector<8x64xf32>
    %166 = vector.extract_strided_slice %5 {offsets = [40, 0], sizes = [8, 64], strides = [1, 1]} : vector<64x64xf32> to vector<8x64xf32>
    %167 = arith.addf %166, %161 : vector<8x64xf32>
    %168 = arith.negf %167 : vector<8x64xf32>
    %169 = math.exp %168 : vector<8x64xf32>
    %cst_57 = arith.constant 1.000000e+00 : f32
    %170 = vector.broadcast %cst_57 : f32 to vector<8x64xf32>
    %171 = arith.addf %170, %169 : vector<8x64xf32>
    %172 = arith.divf %170, %171 : vector<8x64xf32>
    %173 = vector.extract_strided_slice %10 {offsets = [40, 0], sizes = [8, 64], strides = [1, 1]} : vector<64x64xf32> to vector<8x64xf32>
    %174 = arith.addf %173, %162 : vector<8x64xf32>
    %175 = arith.negf %174 : vector<8x64xf32>
    %176 = math.exp %175 : vector<8x64xf32>
    %cst_58 = arith.constant 1.000000e+00 : f32
    %177 = vector.broadcast %cst_58 : f32 to vector<8x64xf32>
    %178 = arith.addf %177, %176 : vector<8x64xf32>
    %179 = arith.divf %177, %178 : vector<8x64xf32>
    %180 = vector.extract_strided_slice %15 {offsets = [40, 0], sizes = [8, 64], strides = [1, 1]} : vector<64x64xf32> to vector<8x64xf32>
    %181 = arith.mulf %172, %165 : vector<8x64xf32>
    %182 = arith.addf %180, %181 : vector<8x64xf32>
    %183 = math.tanh %182 : vector<8x64xf32>
    %cst_59 = arith.constant 1.000000e+00 : f32
    %184 = vector.broadcast %cst_59 : f32 to vector<8x64xf32>
    %185 = arith.subf %184, %179 : vector<8x64xf32>
    %186 = arith.mulf %185, %183 : vector<8x64xf32>
    %187 = arith.mulf %179, %160 : vector<8x64xf32>
    %188 = arith.addf %186, %187 : vector<8x64xf32>
    %cst_60 = arith.constant dense<0.000000e+00> : vector<8x64xf32>
    %189 = tpu.matmul %188, %16, %cst_60 {dimension_numbers = #tpu.dot_dimension_numbers<[1], [0], [0], [1], [0, 0, 1, 1], [], []>} : vector<8x64xf32>, vector<64x64xf32>, vector<8x64xf32> -> vector<8x64xf32>
    %cst_61 = arith.constant dense<0.000000e+00> : vector<8x64xf32>
    %190 = tpu.matmul %188, %17, %cst_61 {dimension_numbers = #tpu.dot_dimension_numbers<[1], [0], [0], [1], [0, 0, 1, 1], [], []>} : vector<8x64xf32>, vector<64x64xf32>, vector<8x64xf32> -> vector<8x64xf32>
    %cst_62 = arith.constant dense<0.000000e+00> : vector<8x64xf32>
    %191 = tpu.matmul %188, %18, %cst_62 {dimension_numbers = #tpu.dot_dimension_numbers<[1], [0], [0], [1], [0, 0, 1, 1], [], []>} : vector<8x64xf32>, vector<64x64xf32>, vector<8x64xf32> -> vector<8x64xf32>
    %192 = vector.broadcast %19 : vector<1x64xf32> to vector<8x64xf32>
    %193 = arith.addf %191, %192 : vector<8x64xf32>
    %194 = vector.extract_strided_slice %5 {offsets = [48, 0], sizes = [8, 64], strides = [1, 1]} : vector<64x64xf32> to vector<8x64xf32>
    %195 = arith.addf %194, %189 : vector<8x64xf32>
    %196 = arith.negf %195 : vector<8x64xf32>
    %197 = math.exp %196 : vector<8x64xf32>
    %cst_63 = arith.constant 1.000000e+00 : f32
    %198 = vector.broadcast %cst_63 : f32 to vector<8x64xf32>
    %199 = arith.addf %198, %197 : vector<8x64xf32>
    %200 = arith.divf %198, %199 : vector<8x64xf32>
    %201 = vector.extract_strided_slice %10 {offsets = [48, 0], sizes = [8, 64], strides = [1, 1]} : vector<64x64xf32> to vector<8x64xf32>
    %202 = arith.addf %201, %190 : vector<8x64xf32>
    %203 = arith.negf %202 : vector<8x64xf32>
    %204 = math.exp %203 : vector<8x64xf32>
    %cst_64 = arith.constant 1.000000e+00 : f32
    %205 = vector.broadcast %cst_64 : f32 to vector<8x64xf32>
    %206 = arith.addf %205, %204 : vector<8x64xf32>
    %207 = arith.divf %205, %206 : vector<8x64xf32>
    %208 = vector.extract_strided_slice %15 {offsets = [48, 0], sizes = [8, 64], strides = [1, 1]} : vector<64x64xf32> to vector<8x64xf32>
    %209 = arith.mulf %200, %193 : vector<8x64xf32>
    %210 = arith.addf %208, %209 : vector<8x64xf32>
    %211 = math.tanh %210 : vector<8x64xf32>
    %cst_65 = arith.constant 1.000000e+00 : f32
    %212 = vector.broadcast %cst_65 : f32 to vector<8x64xf32>
    %213 = arith.subf %212, %207 : vector<8x64xf32>
    %214 = arith.mulf %213, %211 : vector<8x64xf32>
    %215 = arith.mulf %207, %188 : vector<8x64xf32>
    %216 = arith.addf %214, %215 : vector<8x64xf32>
    %cst_66 = arith.constant dense<0.000000e+00> : vector<8x64xf32>
    %217 = tpu.matmul %216, %16, %cst_66 {dimension_numbers = #tpu.dot_dimension_numbers<[1], [0], [0], [1], [0, 0, 1, 1], [], []>} : vector<8x64xf32>, vector<64x64xf32>, vector<8x64xf32> -> vector<8x64xf32>
    %cst_67 = arith.constant dense<0.000000e+00> : vector<8x64xf32>
    %218 = tpu.matmul %216, %17, %cst_67 {dimension_numbers = #tpu.dot_dimension_numbers<[1], [0], [0], [1], [0, 0, 1, 1], [], []>} : vector<8x64xf32>, vector<64x64xf32>, vector<8x64xf32> -> vector<8x64xf32>
    %cst_68 = arith.constant dense<0.000000e+00> : vector<8x64xf32>
    %219 = tpu.matmul %216, %18, %cst_68 {dimension_numbers = #tpu.dot_dimension_numbers<[1], [0], [0], [1], [0, 0, 1, 1], [], []>} : vector<8x64xf32>, vector<64x64xf32>, vector<8x64xf32> -> vector<8x64xf32>
    %220 = vector.broadcast %19 : vector<1x64xf32> to vector<8x64xf32>
    %221 = arith.addf %219, %220 : vector<8x64xf32>
    %222 = vector.extract_strided_slice %5 {offsets = [56, 0], sizes = [8, 64], strides = [1, 1]} : vector<64x64xf32> to vector<8x64xf32>
    %223 = arith.addf %222, %217 : vector<8x64xf32>
    %224 = arith.negf %223 : vector<8x64xf32>
    %225 = math.exp %224 : vector<8x64xf32>
    %cst_69 = arith.constant 1.000000e+00 : f32
    %226 = vector.broadcast %cst_69 : f32 to vector<8x64xf32>
    %227 = arith.addf %226, %225 : vector<8x64xf32>
    %228 = arith.divf %226, %227 : vector<8x64xf32>
    %229 = vector.extract_strided_slice %10 {offsets = [56, 0], sizes = [8, 64], strides = [1, 1]} : vector<64x64xf32> to vector<8x64xf32>
    %230 = arith.addf %229, %218 : vector<8x64xf32>
    %231 = arith.negf %230 : vector<8x64xf32>
    %232 = math.exp %231 : vector<8x64xf32>
    %cst_70 = arith.constant 1.000000e+00 : f32
    %233 = vector.broadcast %cst_70 : f32 to vector<8x64xf32>
    %234 = arith.addf %233, %232 : vector<8x64xf32>
    %235 = arith.divf %233, %234 : vector<8x64xf32>
    %236 = vector.extract_strided_slice %15 {offsets = [56, 0], sizes = [8, 64], strides = [1, 1]} : vector<64x64xf32> to vector<8x64xf32>
    %237 = arith.mulf %228, %221 : vector<8x64xf32>
    %238 = arith.addf %236, %237 : vector<8x64xf32>
    %239 = math.tanh %238 : vector<8x64xf32>
    %cst_71 = arith.constant 1.000000e+00 : f32
    %240 = vector.broadcast %cst_71 : f32 to vector<8x64xf32>
    %241 = arith.subf %240, %235 : vector<8x64xf32>
    %242 = arith.mulf %241, %239 : vector<8x64xf32>
    %243 = arith.mulf %235, %216 : vector<8x64xf32>
    %244 = arith.addf %242, %243 : vector<8x64xf32>
    %c0_72 = arith.constant 0 : index
    %c0_73 = arith.constant 0 : index
    %245 = vector.load %arg11[%c0_72, %c0_73] : memref<1x64xf32, #tpu.memory_space<vmem>>, vector<1x64xf32>
    %246 = vector.broadcast %245 : vector<1x64xf32> to vector<8x64xf32>
    %247 = arith.mulf %244, %246 : vector<8x64xf32>
    %cst_74 = arith.constant dense<0.000000e+00> : vector<8xf32>
    %248 = vector.multi_reduction <add>, %247, %cst_74 [1] : vector<8x64xf32> to vector<8xf32>
    %249 = vector.shape_cast %248 : vector<8xf32> to vector<8x1xf32>
    %c0_75 = arith.constant 0 : index
    %c0_76 = arith.constant 0 : index
    %250 = vector.load %arg12[%c0_75, %c0_76] : memref<1x1xf32, #tpu.memory_space<vmem>>, vector<1x1xf32>
    %251 = vector.broadcast %250 : vector<1x1xf32> to vector<8x1xf32>
    %252 = arith.addf %249, %251 : vector<8x1xf32>
    %c0_77 = arith.constant 0 : index
    %c0_78 = arith.constant 0 : index
    %253 = vector.load %arg13[%c0_77, %c0_78] : memref<8x1xf32, #tpu.memory_space<vmem>>, vector<8x1xf32>
    tpu.vector_store %arg13[%c0_77, %c0_78], %252 {strides = array<i32>} : memref<8x1xf32, #tpu.memory_space<vmem>>, vector<8x1xf32>,
    return
  }
}

</mosaic_0001>

<bundles_post_ra>
// kernel: tpu_custom_call.1
= control target key start
LH: loop header
LB: loop body
LE: loop exit
PB: predicated region body
PF: predicated region fallthrough
CT: control target
= control target key end

     0   :  { %s4211_s0 = inlined_call_operand.vmem [shape: f32[64,4], index: 0, kind: input, shape index: {}]   ;;  %s4212_s1 = inlined_call_operand.vmem [shape: f32[4,64], index: 1, kind: input, shape index: {}]   ;;  %s4213_s2 = inlined_call_operand.vmem [shape: f32[4,64], index: 2, kind: input, shape index: {}]   ;;  %s4214_s3 = inlined_call_operand.vmem [shape: f32[4,64], index: 3, kind: input, shape index: {}]   ;;  %s4215_s4 = inlined_call_operand.vmem [shape: f32[64,64], index: 4, kind: input, shape index: {}]   ;;  %s4216_s5 = inlined_call_operand.hbm [shape: f32[64,64], index: 5, kind: input, shape index: {}]   ;;  %s4217_s6 = inlined_call_operand.hbm [shape: f32[64,64], index: 6, kind: input, shape index: {}]   ;;  %s4218_s7 = inlined_call_operand.vmem [shape: f32[1,64], index: 7, kind: input, shape index: {}]   ;;  %s4219_s8 = inlined_call_operand.vmem [shape: f32[1,64], index: 8, kind: input, shape index: {}]   ;;  %s4220_s9 = inlined_call_operand.vmem [shape: f32[1,64], index: 9, kind: input, shape index: {}]   ;;  %s4221_s10 = inlined_call_operand.vmem [shape: f32[1,64], index: 10, kind: input, shape index: {}]   ;;  %s4222_s11 = inlined_call_operand.vmem [shape: f32[1,64], index: 11, kind: input, shape index: {}]   ;;  %s4223_s12 = inlined_call_operand.<no memory space> [shape: f32[1,1], index: 12, kind: input, shape index: {}]   ;;  %s4224_s13 = inlined_call_operand.vmem [shape: f32[8,1], index: 13, kind: output, shape index: {}]  }
   0x1   :  { %v18_v0 = vstv %s4223_s12 }
   0x2   :  { %19 = vst [vmem:[#allocation2] sm:$0x1] %v18_v0 }
   0x3   :  { %20 = vsyncpa [#allocation4], 0 }
   0x4   :  { %21 = vsyncpa [#allocation6], 0  ;;  %s3623_s27 = smov [#allocation3]   ;;  %s3575_s14 = scalar_lea.hbm %s4216_s5, 1024 }
   0x5   :  { %s37_s28 = sshll.u32 %s3623_s27, 4  ;;  %p3576_p0 = scmp.ne.s32.totalorder %s4216_s5, %s3575_s14  ;;  %s38_s28 = int_to_ptr.vmem [resolvable:$true] %s37_s28 }
   0x6   :  { %p3579_p1 = scmp.lt.u32.totalorder %s3575_s14, %s4216_s5 }
   0x8   :  { %p3581_p2 = pnand %p3579_p1, %p3576_p0 }
   0xa   :  { %3584 = shalt.err (!%p3581_p2)
}
   0xb   :  { %s3585_s12 = scalar_lea.vmem %s38_s28, 1024  ;;  %p3590_p4 = scmp.lt.s32.totalorder %s38_s28, %s38_s28 }
   0xc   :  { %p3586_p3 = scmp.ne.s32.totalorder %s38_s28, %s3585_s12  ;;  %p3591_p5 = scmp.lt.s32.totalorder %s3585_s12, %s3585_s12 }
   0xe   :  { %p3592_p6 = por %p3591_p5, %p3590_p4 }
  0x10   :  { %p3593_p7 = pnand %p3592_p6, %p3586_p3 }
  0x12   :  { %3596 = shalt.err (!%p3593_p7)
}
  0x13   :  { %s3624_s19 = smov 128   ;;  %s3625_s20 = smov 8  }
  0x14   :  { %43 = dma.hbm_to_vmem [thread:$0]  %s4216_s5, 1024, %s38_s28, [#allocation4], %s3624_s19, %s3624_s19, %s3625_s20  }
  0x15   :  { %s3626_s23 = smov [#allocation5]   ;;  %s3597_s27 = scalar_lea.hbm %s4217_s6, 1024 }
  0x16   :  { %s49_s24 = sshll.u32 %s3626_s23, 4  ;;  %p3598_p8 = scmp.ne.s32.totalorder %s4217_s6, %s3597_s27  ;;  %s50_s24 = int_to_ptr.vmem [resolvable:$true] %s49_s24 }
  0x17   :  { %p3601_p9 = scmp.lt.u32.totalorder %s3597_s27, %s4217_s6 }
  0x19   :  { %p3603_p10 = pnand %p3601_p9, %p3598_p8 }
  0x1b   :  { %3606 = shalt.err (!%p3603_p10)
}
  0x1c   :  { %s3607_s16 = scalar_lea.vmem %s50_s24, 1024  ;;  %p3612_p12 = scmp.lt.s32.totalorder %s50_s24, %s50_s24 }
  0x1d   :  { %p3608_p11 = scmp.ne.s32.totalorder %s50_s24, %s3607_s16  ;;  %p3613_p13 = scmp.lt.s32.totalorder %s3607_s16, %s3607_s16 }
  0x1f   :  { %p3614_p0 = por %p3613_p13, %p3612_p12 }
  0x21   :  { %p3615_p1 = pnand %p3614_p0, %p3608_p11 }
  0x23   :  { %3618 = shalt.err (!%p3615_p1)
}
  0x24   :  { %55 = dma.hbm_to_vmem [thread:$0]  %s4217_s6, 1024, %s50_s24, [#allocation6], %s3624_s19, %s3624_s19, %s3625_s20  }
  0x25   :  { %3619 = dma.done.wait [#allocation4], 1024  }
  0x26   :  { %3620 = vsyncadd [#allocation4], 4294966272 }
  0x27   :  { %3621 = dma.done.wait [#allocation6], 1024  }
  0x28   :  { %3622 = vsyncadd [#allocation6], 4294966272  ;;  %vm115_vm0 = vcmask 1043456   ;;  %v82_v1 = vld [vmem:[%s4212_s1] sm:$0xf]  ;;  %vm90_vm1 = vcmask 31744  }
  0x29   :  { %v74_v2 = vld [vmem:[%s4211_s0] sm:$0xff]  ;;  %2700 = vmatprep.subr.msk.mxu0 %vm115_vm0, %v82_v1  ;;  %3486 = vmatprep.subr.msk.mxu1 %vm115_vm0, %v82_v1  ;;  %v75_v4 = vld [vmem:[%s4211_s0 + $0x8] sm:$0xff]  ;;  %v76_v7 = vld [vmem:[%s4211_s0 + $0x10] sm:$0xff]  ;;  %v3627_v16 = vmov 0.0|0.0   ;;  %vm3628_vm2 = vmmov 0   ;;  %v3629_v40 = vmov 0.0  }
  0x2a   :  { %v78_v3 = vld [vmem:[%s4211_s0 + $0x20] sm:$0xff]  ;;  %v3744_v5 = vld [vmem:[%s4211_s0 + $0x28] sm:$0xff]  ;;  %2701 = vmatpush3.msk.msra.mxu0 %vm115_vm0, %v82_v1  ;;  %3487 = vmatpush3.msk.msra.mxu1 %vm115_vm0, %v82_v1  ;;  %v3759_v8 = vld [vmem:[%s4211_s0 + $0x30] sm:$0xff]  ;;  %vm481_vm3 = vcmask 523264   ;;  %vm2379_vm4 = vcmask 7168  }
  0x2b   :  { %v224_v6 = vld [vmem:[%s4213_s2] sm:$0xf]  ;;  %2702 = vmatprep.mubr.msk.f32.mxu0 %vm90_vm1, %v74_v2  ;;  %2708 = vmatprep.mubr.msk.f32.mxu1 %vm90_vm1, %v78_v3  ;;  %v77_v10 = vld [vmem:[%s4211_s0 + $0x18] sm:$0xff]  ;;  %v457_v13 = vld [vmem:[%s4215_s4 + $0x8] sm:$0xff] }
  0x2c   :  { %2703 = vmatmul.mubr.msk.f32.vlgmr.msra.gmra.mrb[0].mxu0 %vm90_vm1, %v75_v4  ;;  %2709 = vmatmul.mubr.msk.f32.vlgmr.msra.gmra.mrb[0].mxu1 %vm90_vm1, %v3744_v5  ;;  %v340_v9 = vld [vmem:[%s4214_s3] sm:$0xf]  ;;  %v3775_v11 = vld [vmem:[%s4211_s0 + $0x38] sm:$0xff]  ;;  %v465_v15 = vld [vmem:[#allocation3 + $0x8] sm:$0xff] }
  0x2d   :  { %2714 = vmatprep.subr.msk.mxu1 %vm115_vm0, %v224_v6  ;;  %2705 = vmatprep.mubr.msk.f32.mxu0 %vm90_vm1, %v76_v7  ;;  %v456_v12 = vld [vmem:[%s4215_s4] sm:$0xff]  ;;  %v458_v19 = vld [vmem:[%s4215_s4 + $0x10] sm:$0xff]  ;;  %v459_v20 = vld [vmem:[%s4215_s4 + $0x18] sm:$0xff] }
  0x2e   :  { %2715 = vmatpush3.msk.msra.mxu1 %vm115_vm0, %v224_v6  ;;  %2711 = vmatprep.mubr.msk.f32.mxu1 %vm90_vm1, %v3759_v8  ;;  %v464_v14 = vld [vmem:[#allocation3] sm:$0xff]  ;;  %v3793_v17 = vpack.c.bf16 %v457_v13, %v456_v12  ;;  %v466_v21 = vld [vmem:[#allocation3 + $0x10] sm:$0xff]  ;;  %v467_v22 = vld [vmem:[#allocation3 + $0x18] sm:$0xff]  ;;  %v3809_v23 = vpack.c.bf16 %v459_v20, %v458_v19 }
  0x2f   :  { %2728 = vmatprep.subr.msk.mxu0 %vm115_vm0, %v340_v9  ;;  %3198 = vmatprep.subr.bf16.mxu1 %v3627_v16  ;;  %v3795_v18 = vpack.c.bf16 %v465_v15, %v464_v14  ;;  %v3811_v24 = vpack.c.bf16 %v467_v22, %v466_v21  ;;  %v460_v25 = vld [vmem:[%s4215_s4 + $0x20] sm:$0xff]  ;;  %v461_v26 = vld [vmem:[%s4215_s4 + $0x28] sm:$0xff]  ;;  %v462_v31 = vld [vmem:[%s4215_s4 + $0x30] sm:$0xff] }
  0x30   :  { %2706 = vmatmul.mubr.msk.f32.gmra.mrb[2].mxu0 %vm90_vm1, %v77_v10  ;;  %2712 = vmatmul.mubr.msk.f32.gmra.mrb[2].mxu1 %vm90_vm1, %v3775_v11  ;;  %v468_v27 = vld [vmem:[#allocation3 + $0x20] sm:$0xff]  ;;  %v469_v28 = vld [vmem:[#allocation3 + $0x28] sm:$0xff]  ;;  %v3827_v29 = vpack.c.bf16 %v461_v26, %v460_v25  ;;  %v463_v32 = vld [vmem:[%s4215_s4 + $0x38] sm:$0xff] }
  0x31   :  { %2716 = vmatprep.mubr.msk.f32.mxu1 %vm90_vm1, %v74_v2  ;;  %2729 = vmatpush3.msk.msra.mxu0 %vm115_vm0, %v340_v9  ;;  %v3829_v30 = vpack.c.bf16 %v469_v28, %v468_v27  ;;  %v470_v33 = vld [vmem:[#allocation3 + $0x30] sm:$0xff]  ;;  %v471_v34 = vld [vmem:[#allocation3 + $0x38] sm:$0xff]  ;;  %v3847_v35 = vpack.c.bf16 %v463_v32, %v462_v31  ;;  %v472_v37 = vld [vmem:[#allocation5] sm:$0xff] }
  0x32   :  { %2730 = vmatprep.mubr.msk.f32.mxu0 %vm90_vm1, %v74_v2  ;;  %3210 = vmatprep.subr.bf16.mxu0 %v3627_v16  ;;  %v3849_v36 = vpack.c.bf16 %v471_v34, %v470_v33  ;;  %v473_v38 = vld [vmem:[#allocation5 + $0x8] sm:$0xff]  ;;  %v474_v41 = vld [vmem:[#allocation5 + $0x10] sm:$0xff]  ;;  %v475_v42 = vld [vmem:[#allocation5 + $0x18] sm:$0xff] }
  0x33   :  { %v3863_v39 = vpack.c.bf16 %v473_v38, %v472_v37  ;;  %v3874_v43 = vpack.c.bf16 %v475_v42, %v474_v41  ;;  %v476_v44 = vld [vmem:[#allocation5 + $0x20] sm:$0xff]  ;;  %v477_v45 = vld [vmem:[#allocation5 + $0x28] sm:$0xff]  ;;  %v478_v47 = vld [vmem:[#allocation5 + $0x30] sm:$0xff] }
  0x34   :  { %2717 = vmatmul.mubr.msk.f32.vlgmr.msra.gmra.mrb[4].mxu1 %vm90_vm1, %v75_v4  ;;  %2731 = vmatmul.mubr.msk.f32.vlgmr.msra.gmra.mrb[4].mxu0 %vm90_vm1, %v75_v4  ;;  %v3884_v46 = vpack.c.bf16 %v477_v45, %v476_v44  ;;  %v479_v48 = vld [vmem:[#allocation5 + $0x38] sm:$0xff] }
  0x35   :  { %3200 = vmatpush3.bf16.msra.mxu1 %v3793_v17  ;;  %3212 = vmatpush3.bf16.msra.mxu0 %v3795_v18  ;;  %v3890_v49 = vpack.c.bf16 %v479_v48, %v478_v47  ;;  %v2387_v50 = vld [vmem:[%s4218_s7] ss:$0 sm:$0xff] }
  0x36   :  { %2719 = vmatprep.mubr.msk.f32.mxu1 %vm90_vm1, %v76_v7  ;;  %2733 = vmatprep.mubr.msk.f32.mxu0 %vm90_vm1, %v76_v7  ;;  %v2397_v1 = vld [vmem:[%s4219_s8] ss:$0 sm:$0xff] }
  0x37   :  { %3201 = vmatprep.subr.bf16.mxu1 %v3627_v16  ;;  %3213 = vmatprep.subr.bf16.mxu0 %v3627_v16 }
  0x38   :  { %2720 = vmatmul.mubr.msk.f32.gmra.mrb[6].mxu1 %vm90_vm1, %v77_v10  ;;  %2734 = vmatmul.mubr.msk.f32.gmra.mrb[6].mxu0 %vm90_vm1, %v77_v10 }
  0x39   :  { %3203 = vmatpush3.bf16.msra.mxu1 %v3809_v23  ;;  %3215 = vmatpush3.bf16.msra.mxu0 %v3811_v24 }
  0x3a   :  { %2722 = vmatprep.mubr.msk.f32.mxu1 %vm90_vm1, %v78_v3  ;;  %2736 = vmatprep.mubr.msk.f32.mxu0 %vm90_vm1, %v78_v3  ;;  %v2407_v3 = vld [vmem:[%s4220_s9] ss:$0 sm:$0xff] }
  0x3b   :  { %3204 = vmatprep.subr.bf16.mxu1 %v3627_v16  ;;  %3216 = vmatprep.subr.bf16.mxu0 %v3627_v16 }
  0x3c   :  { %2723 = vmatmul.mubr.msk.f32.gmra.mrb[8].mxu1 %vm90_vm1, %v3744_v5  ;;  %2737 = vmatmul.mubr.msk.f32.gmra.mrb[8].mxu0 %vm90_vm1, %v3744_v5 }
  0x3d   :  { %3206 = vmatpush3.bf16.msra.mxu1 %v3827_v29  ;;  %3218 = vmatpush3.bf16.msra.mxu0 %v3829_v30 }
  0x3e   :  { %2725 = vmatprep.mubr.msk.f32.mxu1 %vm90_vm1, %v3759_v8  ;;  %2739 = vmatprep.mubr.msk.f32.mxu0 %vm90_vm1, %v3759_v8 }
  0x3f   :  { %3207 = vmatprep.subr.bf16.mxu1 %v3627_v16  ;;  %3219 = vmatprep.subr.bf16.mxu0 %v3627_v16 }
  0x40   :  { %2726 = vmatmul.mubr.msk.f32.gmra.mrb[10].mxu1 %vm90_vm1, %v3775_v11  ;;  %2740 = vmatmul.mubr.msk.f32.gmra.mrb[10].mxu0 %vm90_vm1, %v3775_v11 }
  0x41   :  { %3209 = vmatpush3.bf16.msra.mxu1 %v3847_v35  ;;  %3221 = vmatpush3.bf16.msra.mxu0 %v3849_v36 }
  0x42   :  { %2758 = vmatprep.mubr.msk.f32.mxu1 %vm3628_vm2, %v3629_v40  ;;  %2777 = vmatprep.mubr.msk.f32.mxu0 %vm3628_vm2, %v3629_v40 }
  0x43   :  { %3222 = vmatprep.subr.bf16.mxu1 %v3627_v16  ;;  %3234 = vmatprep.subr.bf16.mxu0 %v3627_v16 }
  0x44   :  { %2759 = vmatmul.mubr.f32.vlgmr.msra.gmra.mrb[12].mxu1 %v3629_v40  ;;  %2778 = vmatmul.mubr.f32.vlgmr.msra.gmra.mrb[12].mxu0 %v3629_v40 }
  0x45   :  { %3224 = vmatpush3.bf16.msra.mxu1 %v3863_v39  ;;  %2796 = vmatprep.mubr.msk.f32.mxu1 %vm3628_vm2, %v3629_v40 }
  0x46   :  { %3225 = vmatprep.subr.bf16.mxu1 %v3627_v16  ;;  %3236 = vmatpush3.bf16.msra.mxu0 %v3793_v17 }
  0x47   :  { %3237 = vmatprep.subr.bf16.mxu0 %v3627_v16  ;;  %2815 = vmatprep.mubr.msk.f32.mxu0 %vm3628_vm2, %v3629_v40 }
  0x49   :  { %3227 = vmatpush3.bf16.msra.mxu1 %v3874_v43 }
  0x4a   :  { %3228 = vmatprep.subr.bf16.mxu1 %v3627_v16  ;;  %3239 = vmatpush3.bf16.msra.mxu0 %v3809_v23 }
  0x4b   :  { %3240 = vmatprep.subr.bf16.mxu0 %v3627_v16 }
  0x4d   :  { %3230 = vmatpush3.bf16.msra.mxu1 %v3884_v46 }
  0x4e   :  { %3231 = vmatprep.subr.bf16.mxu1 %v3627_v16  ;;  %3242 = vmatpush3.bf16.msra.mxu0 %v3827_v29 }
  0x4f   :  { %3243 = vmatprep.subr.bf16.mxu0 %v3627_v16 }
  0x51   :  { %3233 = vmatpush3.bf16.msra.mxu1 %v3890_v49 }
  0x52   :  { %3246 = vmatprep.subr.bf16.mxu1 %v3627_v16  ;;  %3245 = vmatpush3.bf16.msra.mxu0 %v3847_v35 }
  0x53   :  { %3258 = vmatprep.subr.bf16.mxu0 %v3627_v16 }
  0x54   :  { %2797 = vmatmul.mubr.f32.vlgmr.msra.gmra.mrb[14].mxu1 %v3629_v40 }
  0x55   :  { %3248 = vmatpush3.bf16.msra.mxu1 %v3795_v18  ;;  %2834 = vmatprep.mubr.msk.f32.mxu1 %vm3628_vm2, %v3629_v40 }
  0x56   :  { %3249 = vmatprep.subr.bf16.mxu1 %v3627_v16 }
  0x59   :  { %3251 = vmatpush3.bf16.msra.mxu1 %v3811_v24 }
  0x5a   :  { %3252 = vmatprep.subr.bf16.mxu1 %v3627_v16 }
  0x5d   :  { %3254 = vmatpush3.bf16.msra.mxu1 %v3829_v30 }
  0x5e   :  { %3255 = vmatprep.subr.bf16.mxu1 %v3627_v16 }
  0x61   :  { %3257 = vmatpush3.bf16.msra.mxu1 %v3849_v36 }
  0x62   :  { %3270 = vmatprep.subr.bf16.mxu1 %v3627_v16 }
  0xff   :  { %v2710_v51 = vpop.f32.mrb[0].mxu1  ;;  %v2704_v52 = vpop.f32.mrb[0].mxu0 }
 0x100   :  { %v3913_v53 = vadd.f32 %v2710_v51, %v2387_v50  ;;  %v205_v54 = vpop.f32.mrb[1].mxu1  ;;  %v3915_v55 = vadd.f32 %v2704_v52, %v2387_v50  ;;  %v185_v56 = vpop.f32.mrb[1].mxu0 }
 0x101   :  { %v3917_v57 = vadd.f32 %v2387_v50, %v205_v54  ;;  %v186_v48 = vadd.f32 %v2387_v50, %v185_v56 }
 0x103   :  { %v2713_v58 = vpop.f32.mrb[2].mxu1  ;;  %v2707_v59 = vpop.f32.mrb[2].mxu0 }
 0x104   :  { %v3919_v60 = vadd.f32 %v2713_v58, %v2387_v50  ;;  %v215_v61 = vpop.f32.mrb[3].mxu1  ;;  %v3921_v62 = vadd.f32 %v2707_v59, %v2387_v50  ;;  %v195_v63 = vpop.f32.mrb[3].mxu0 }
 0x105   :  { %v3923_v0 = vadd.f32 %v2387_v50, %v215_v61  ;;  %v3928_v2 = vadd.f32 %v2387_v50, %v195_v63  ;;  %v3964_v50 = vld [vmem:[%s4221_s10] ss:$0 sm:$0xff] }
 0x107   :  { %v2718_v4 = vpop.f32.mrb[4].mxu1  ;;  %v2732_v5 = vpop.f32.mrb[4].mxu0 }
 0x108   :  { %v3933_v6 = vadd.f32 %v2718_v4, %v2397_v1  ;;  %v301_v7 = vpop.f32.mrb[5].mxu1  ;;  %v3935_v8 = vadd.f32 %v2732_v5, %v2407_v3  ;;  %v417_v9 = vpop.f32.mrb[5].mxu0 }
 0x109   :  { %v302_v47 = vadd.f32 %v2397_v1, %v301_v7 }
 0x10b   :  { %v2721_v10 = vpop.f32.mrb[6].mxu1  ;;  %v2735_v11 = vpop.f32.mrb[6].mxu0 }
 0x10c   :  { %v3937_v12 = vadd.f32 %v2721_v10, %v2397_v1  ;;  %v311_v13 = vpop.f32.mrb[7].mxu1  ;;  %v3939_v14 = vadd.f32 %v2735_v11, %v2407_v3  ;;  %v427_v15 = vpop.f32.mrb[7].mxu0 }
 0x10d   :  { %v3941_v19 = vadd.f32 %v2397_v1, %v311_v13  ;;  %v3943_v20 = vadd.f32 %v2407_v3, %v427_v15 }
 0x10f   :  { %v2724_v21 = vpop.f32.mrb[8].mxu1  ;;  %v2738_v22 = vpop.f32.mrb[8].mxu0 }
 0x110   :  { %v3945_v25 = vadd.f32 %v2724_v21, %v2397_v1  ;;  %v321_v26 = vpop.f32.mrb[9].mxu1  ;;  %v3947_v27 = vadd.f32 %v2738_v22, %v2407_v3  ;;  %v437_v28 = vpop.f32.mrb[9].mxu0  ;;  %v418_v21 = vadd.f32 %v2407_v3, %v417_v9 }
 0x111   :  { %v3949_v31 = vadd.f32 %v2397_v1, %v321_v26  ;;  %v3951_v32 = vadd.f32 %v2407_v3, %v437_v28 }
 0x113   :  { %v2727_v33 = vpop.f32.mrb[10].mxu1  ;;  %v2741_v34 = vpop.f32.mrb[10].mxu0 }
 0x114   :  { %v3953_v37 = vadd.f32 %v2727_v33, %v2397_v1  ;;  %v331_v38 = vpop.f32.mrb[11].mxu1  ;;  %v3955_v41 = vadd.f32 %v2741_v34, %v2407_v3  ;;  %v447_v42 = vpop.f32.mrb[11].mxu0 }
 0x115   :  { %v3957_v44 = vadd.f32 %v2397_v1, %v331_v38  ;;  %v3959_v45 = vadd.f32 %v2407_v3, %v447_v42 }
 0x117   :  { %v551_v51 = vpop.f32.mrb[12].mxu1  ;;  %v621_v52 = vpop.f32.mrb[12].mxu0 }
 0x118   :  { %v701_v54 = vadd.f32 %v551_v51, %v186_v48  ;;  %v708_v58 = vadd.f32 %v621_v52, %v302_v47  ;;  %v2760_v59 = vpop.f32.mrb[13].mxu1  ;;  %v2779_v61 = vpop.f32.mrb[13].mxu0 }
 0x11a   :  { %v2418_v63 = vmul.f32 -1.442695, %v701_v54  ;;  %v2419_v4 = vmul.f32 -1.442695, %v708_v58 }
 0x11c   :  { %3495 = vpow2.f32 %v2418_v63 }
 0x11d   :  { %3497 = vpow2.f32 %v2419_v4 }
 0x126   :  { %v3496_v5 = vpop.eup %3495 }
 0x127   :  { %v705_v10 = vadd.f32 1.0, %v3496_v5  ;;  %v697_v11 = vpop.f32.mrb[14].mxu1  ;;  %v3498_v15 = vpop.eup %3497 }
 0x128   :  { %v2798_v13 = vpop.f32.mrb[15].mxu1  ;;  %v712_v56 = vadd.f32 1.0, %v3498_v15  ;;  %v698_v1 = vadd.f32 %v3964_v50, %v697_v11 }
 0x129   :  { %3499 = vrcp.f32 %v705_v10 }
 0x12a   :  { %3501 = vrcp.f32 %v712_v56 }
 0x133   :  { %v3500_v7 = vpop.eup %3499 }
 0x134   :  { %v715_v22 = vmul.f32 %v3500_v7, %v698_v1  ;;  %v3502_v28 = vpop.eup %3501 }
 0x135   :  { %v718_v33 = vsub.f32 1.0, %v3502_v28  ;;  %v720_v42 = vmul.f32 0.0, %v3502_v28 }
 0x136   :  { %v716_v26 = vadd.f32 %v715_v22, %v418_v21 }
 0x138   :  { %3503 = vtanh.f32 %v716_v26 }
 0x142   :  { %v3504_v34 = vpop.eup %3503 }
 0x143   :  { %v719_v38 = vmul.f32 %v3504_v34, %v718_v33 }
 0x145   :  { %v721_v47 = vadd.f32 %v720_v42, %v719_v38 }
 0x147   :  { %2816 = vmatmul.mubr.msk.f32.vlgmr.msra.gmra.mrb[14].mxu0 %vm481_vm3, %v721_v47  ;;  %2835 = vmatmul.mubr.msk.f32.vlgmr.msra.gmra.mrb[16].mxu1 %vm481_vm3, %v721_v47 }
 0x148   :  { %3260 = vmatpush3.bf16.msra.mxu0 %v3863_v39  ;;  %2853 = vmatprep.mubr.msk.f32.mxu0 %vm3628_vm2, %v3629_v40 }
 0x149   :  { %3261 = vmatprep.subr.bf16.mxu0 %v3627_v16  ;;  %3272 = vmatpush3.bf16.msra.mxu1 %v3793_v17 }
 0x14a   :  { %3273 = vmatprep.subr.bf16.mxu1 %v3627_v16  ;;  %2872 = vmatprep.mubr.msk.f32.mxu1 %vm3628_vm2, %v3629_v40 }
 0x14c   :  { %3263 = vmatpush3.bf16.msra.mxu0 %v3874_v43 }
 0x14d   :  { %3264 = vmatprep.subr.bf16.mxu0 %v3627_v16  ;;  %3275 = vmatpush3.bf16.msra.mxu1 %v3809_v23 }
 0x14e   :  { %3276 = vmatprep.subr.bf16.mxu1 %v3627_v16 }
 0x150   :  { %3266 = vmatpush3.bf16.msra.mxu0 %v3884_v46 }
 0x151   :  { %3267 = vmatprep.subr.bf16.mxu0 %v3627_v16  ;;  %3278 = vmatpush3.bf16.msra.mxu1 %v3827_v29 }
 0x152   :  { %3279 = vmatprep.subr.bf16.mxu1 %v3627_v16 }
 0x154   :  { %3269 = vmatpush3.bf16.msra.mxu0 %v3890_v49 }
 0x155   :  { %3282 = vmatprep.subr.bf16.mxu0 %v3627_v16  ;;  %3281 = vmatpush3.bf16.msra.mxu1 %v3847_v35 }
 0x156   :  { %3294 = vmatprep.subr.bf16.mxu1 %v3627_v16 }
 0x157   :  { %2854 = vmatmul.mubr.msk.f32.vlgmr.msra.gmra.mrb[16].mxu0 %vm481_vm3, %v721_v47 }
 0x158   :  { %3284 = vmatpush3.bf16.msra.mxu0 %v3795_v18  ;;  %2891 = vmatprep.mubr.msk.f32.mxu0 %vm3628_vm2, %v3629_v40 }
 0x159   :  { %3285 = vmatprep.subr.bf16.mxu0 %v3627_v16 }
 0x15c   :  { %3287 = vmatpush3.bf16.msra.mxu0 %v3811_v24 }
 0x15d   :  { %3288 = vmatprep.subr.bf16.mxu0 %v3627_v16 }
 0x160   :  { %3290 = vmatpush3.bf16.msra.mxu0 %v3829_v30 }
 0x161   :  { %3291 = vmatprep.subr.bf16.mxu0 %v3627_v16 }
 0x164   :  { %3293 = vmatpush3.bf16.msra.mxu0 %v3849_v36 }
 0x165   :  { %3306 = vmatprep.subr.bf16.mxu0 %v3627_v16 }
 0x21a   :  { %v791_v3 = vpop.f32.mrb[14].mxu0  ;;  %v861_v9 = vpop.f32.mrb[16].mxu1 }
 0x21b   :  { %v935_v48 = vadd.f32 %v791_v3, %v3915_v55  ;;  %v942_v51 = vadd.f32 %v861_v9, %v3933_v6  ;;  %v2817_v52 = vpop.f32.mrb[15].mxu0  ;;  %v2836_v54 = vpop.f32.mrb[17].mxu1 }
 0x21d   :  { %v2423_v58 = vmul.f32 -1.442695, %v935_v48  ;;  %v2424_v59 = vmul.f32 -1.442695, %v942_v51 }
 0x21f   :  { %3505 = vpow2.f32 %v2423_v58 }
 0x220   :  { %3507 = vpow2.f32 %v2424_v59 }
 0x229   :  { %v3506_v61 = vpop.eup %3505 }
 0x22a   :  { %v939_v63 = vadd.f32 1.0, %v3506_v61  ;;  %v931_v4 = vpop.f32.mrb[16].mxu0  ;;  %v3508_v10 = vpop.eup %3507 }
 0x22b   :  { %v2855_v5 = vpop.f32.mrb[17].mxu0  ;;  %v946_v11 = vadd.f32 1.0, %v3508_v10  ;;  %v932_v13 = vadd.f32 %v3964_v50, %v931_v4 }
 0x22c   :  { %3509 = vrcp.f32 %v939_v63 }
 0x22d   :  { %3511 = vrcp.f32 %v946_v11 }
 0x236   :  { %v3510_v15 = vpop.eup %3509 }
 0x237   :  { %v949_v55 = vmul.f32 %v3510_v15, %v932_v13  ;;  %v3512_v56 = vpop.eup %3511 }
 0x238   :  { %v952_v1 = vsub.f32 1.0, %v3512_v56  ;;  %v954_v22 = vmul.f32 %v3512_v56, %v721_v47 }
 0x239   :  { %v950_v6 = vadd.f32 %v949_v55, %v3935_v8 }
 0x23b   :  { %3513 = vtanh.f32 %v950_v6 }
 0x245   :  { %v3514_v7 = vpop.eup %3513 }
 0x246   :  { %v953_v21 = vmul.f32 %v3514_v7, %v952_v1 }
 0x248   :  { %v955_v26 = vadd.f32 %v954_v22, %v953_v21 }
 0x24a   :  { %2873 = vmatmul.mubr.msk.f32.vlgmr.msra.gmra.mrb[18].mxu1 %vm481_vm3, %v955_v26  ;;  %2892 = vmatmul.mubr.msk.f32.vlgmr.msra.gmra.mrb[18].mxu0 %vm481_vm3, %v955_v26 }
 0x24b   :  { %3296 = vmatpush3.bf16.msra.mxu1 %v3863_v39  ;;  %2910 = vmatprep.mubr.msk.f32.mxu1 %vm3628_vm2, %v3629_v40 }
 0x24c   :  { %3297 = vmatprep.subr.bf16.mxu1 %v3627_v16  ;;  %3308 = vmatpush3.bf16.msra.mxu0 %v3793_v17 }
 0x24d   :  { %3309 = vmatprep.subr.bf16.mxu0 %v3627_v16  ;;  %2929 = vmatprep.mubr.msk.f32.mxu0 %vm3628_vm2, %v3629_v40 }
 0x24f   :  { %3299 = vmatpush3.bf16.msra.mxu1 %v3874_v43 }
 0x250   :  { %3300 = vmatprep.subr.bf16.mxu1 %v3627_v16  ;;  %3311 = vmatpush3.bf16.msra.mxu0 %v3809_v23 }
 0x251   :  { %3312 = vmatprep.subr.bf16.mxu0 %v3627_v16 }
 0x253   :  { %3302 = vmatpush3.bf16.msra.mxu1 %v3884_v46 }
 0x254   :  { %3303 = vmatprep.subr.bf16.mxu1 %v3627_v16  ;;  %3314 = vmatpush3.bf16.msra.mxu0 %v3827_v29 }
 0x255   :  { %3315 = vmatprep.subr.bf16.mxu0 %v3627_v16 }
 0x257   :  { %3305 = vmatpush3.bf16.msra.mxu1 %v3890_v49 }
 0x258   :  { %3318 = vmatprep.subr.bf16.mxu1 %v3627_v16  ;;  %3317 = vmatpush3.bf16.msra.mxu0 %v3847_v35 }
 0x259   :  { %3330 = vmatprep.subr.bf16.mxu0 %v3627_v16 }
 0x25a   :  { %2911 = vmatmul.mubr.msk.f32.vlgmr.msra.gmra.mrb[20].mxu1 %vm481_vm3, %v955_v26 }
 0x25b   :  { %3320 = vmatpush3.bf16.msra.mxu1 %v3795_v18  ;;  %2948 = vmatprep.mubr.msk.f32.mxu1 %vm3628_vm2, %v3629_v40 }
 0x25c   :  { %3321 = vmatprep.subr.bf16.mxu1 %v3627_v16 }
 0x25f   :  { %3323 = vmatpush3.bf16.msra.mxu1 %v3811_v24 }
 0x260   :  { %3324 = vmatprep.subr.bf16.mxu1 %v3627_v16 }
 0x263   :  { %3326 = vmatpush3.bf16.msra.mxu1 %v3829_v30 }
 0x264   :  { %3327 = vmatprep.subr.bf16.mxu1 %v3627_v16 }
 0x267   :  { %3329 = vmatpush3.bf16.msra.mxu1 %v3849_v36 }
 0x268   :  { %3342 = vmatprep.subr.bf16.mxu1 %v3627_v16 }
 0x31d   :  { %v1025_v8 = vpop.f32.mrb[18].mxu1  ;;  %v1095_v28 = vpop.f32.mrb[18].mxu0 }
 0x31e   :  { %v1169_v33 = vadd.f32 %v1025_v8, %v3928_v2  ;;  %v1176_v34 = vadd.f32 %v1095_v28, %v3941_v19  ;;  %v2874_v38 = vpop.f32.mrb[19].mxu1  ;;  %v2893_v42 = vpop.f32.mrb[19].mxu0 }
 0x320   :  { %v2428_v47 = vmul.f32 -1.442695, %v1169_v33  ;;  %v2429_v3 = vmul.f32 -1.442695, %v1176_v34 }
 0x322   :  { %3515 = vpow2.f32 %v2428_v47 }
 0x323   :  { %3517 = vpow2.f32 %v2429_v3 }
 0x32c   :  { %v3516_v9 = vpop.eup %3515 }
 0x32d   :  { %v1173_v48 = vadd.f32 1.0, %v3516_v9  ;;  %v1165_v51 = vpop.f32.mrb[20].mxu1  ;;  %v3518_v54 = vpop.eup %3517 }
 0x32e   :  { %v2912_v52 = vpop.f32.mrb[21].mxu1  ;;  %v1180_v58 = vadd.f32 1.0, %v3518_v54  ;;  %v1166_v59 = vadd.f32 %v3964_v50, %v1165_v51 }
 0x32f   :  { %3519 = vrcp.f32 %v1173_v48 }
 0x330   :  { %3521 = vrcp.f32 %v1180_v58 }
 0x339   :  { %v3520_v61 = vpop.eup %3519 }
 0x33a   :  { %v1183_v2 = vmul.f32 %v3520_v61, %v1166_v59  ;;  %v3522_v63 = vpop.eup %3521 }
 0x33b   :  { %v1186_v4 = vsub.f32 1.0, %v3522_v63  ;;  %v1188_v11 = vmul.f32 %v3522_v63, %v955_v26 }
 0x33c   :  { %v1184_v19 = vadd.f32 %v1183_v2, %v3943_v20 }
 0x33e   :  { %3523 = vtanh.f32 %v1184_v19 }
 0x348   :  { %v3524_v5 = vpop.eup %3523 }
 0x349   :  { %v1187_v10 = vmul.f32 %v3524_v5, %v1186_v4 }
 0x34b   :  { %v1189_v13 = vadd.f32 %v1188_v11, %v1187_v10 }
 0x34d   :  { %2930 = vmatmul.mubr.msk.f32.vlgmr.msra.gmra.mrb[20].mxu0 %vm481_vm3, %v1189_v13  ;;  %2949 = vmatmul.mubr.msk.f32.vlgmr.msra.gmra.mrb[22].mxu1 %vm481_vm3, %v1189_v13 }
 0x34e   :  { %3332 = vmatpush3.bf16.msra.mxu0 %v3863_v39  ;;  %2967 = vmatprep.mubr.msk.f32.mxu0 %vm3628_vm2, %v3629_v40 }
 0x34f   :  { %3333 = vmatprep.subr.bf16.mxu0 %v3627_v16  ;;  %3344 = vmatpush3.bf16.msra.mxu1 %v3793_v17 }
 0x350   :  { %3345 = vmatprep.subr.bf16.mxu1 %v3627_v16  ;;  %2986 = vmatprep.mubr.msk.f32.mxu1 %vm3628_vm2, %v3629_v40 }
 0x352   :  { %3335 = vmatpush3.bf16.msra.mxu0 %v3874_v43 }
 0x353   :  { %3336 = vmatprep.subr.bf16.mxu0 %v3627_v16  ;;  %3347 = vmatpush3.bf16.msra.mxu1 %v3809_v23 }
 0x354   :  { %3348 = vmatprep.subr.bf16.mxu1 %v3627_v16 }
 0x356   :  { %3338 = vmatpush3.bf16.msra.mxu0 %v3884_v46 }
 0x357   :  { %3339 = vmatprep.subr.bf16.mxu0 %v3627_v16  ;;  %3350 = vmatpush3.bf16.msra.mxu1 %v3827_v29 }
 0x358   :  { %3351 = vmatprep.subr.bf16.mxu1 %v3627_v16 }
 0x35a   :  { %3341 = vmatpush3.bf16.msra.mxu0 %v3890_v49 }
 0x35b   :  { %3354 = vmatprep.subr.bf16.mxu0 %v3627_v16  ;;  %3353 = vmatpush3.bf16.msra.mxu1 %v3847_v35 }
 0x35c   :  { %3366 = vmatprep.subr.bf16.mxu1 %v3627_v16 }
 0x35d   :  { %2968 = vmatmul.mubr.msk.f32.vlgmr.msra.gmra.mrb[22].mxu0 %vm481_vm3, %v1189_v13 }
 0x35e   :  { %3356 = vmatpush3.bf16.msra.mxu0 %v3795_v18  ;;  %3005 = vmatprep.mubr.msk.f32.mxu0 %vm3628_vm2, %v3629_v40 }
 0x35f   :  { %3357 = vmatprep.subr.bf16.mxu0 %v3627_v16 }
 0x362   :  { %3359 = vmatpush3.bf16.msra.mxu0 %v3811_v24 }
 0x363   :  { %3360 = vmatprep.subr.bf16.mxu0 %v3627_v16 }
 0x366   :  { %3362 = vmatpush3.bf16.msra.mxu0 %v3829_v30 }
 0x367   :  { %3363 = vmatprep.subr.bf16.mxu0 %v3627_v16 }
 0x36a   :  { %3365 = vmatpush3.bf16.msra.mxu0 %v3849_v36 }
 0x36b   :  { %3378 = vmatprep.subr.bf16.mxu0 %v3627_v16 }
 0x420   :  { %v1259_v20 = vpop.f32.mrb[20].mxu0  ;;  %v1329_v15 = vpop.f32.mrb[22].mxu1 }
 0x421   :  { %v1403_v55 = vadd.f32 %v1259_v20, %v3921_v62  ;;  %v1410_v6 = vadd.f32 %v1329_v15, %v3937_v12  ;;  %v2931_v56 = vpop.f32.mrb[21].mxu0  ;;  %v2950_v1 = vpop.f32.mrb[23].mxu1 }
 0x423   :  { %v2433_v7 = vmul.f32 -1.442695, %v1403_v55  ;;  %v2434_v21 = vmul.f32 -1.442695, %v1410_v6 }
 0x425   :  { %3525 = vpow2.f32 %v2433_v7 }
 0x426   :  { %3527 = vpow2.f32 %v2434_v21 }
 0x42f   :  { %v3526_v22 = vpop.eup %3525 }
 0x430   :  { %v1407_v26 = vadd.f32 1.0, %v3526_v22  ;;  %v1399_v8 = vpop.f32.mrb[22].mxu0  ;;  %v3528_v33 = vpop.eup %3527 }
 0x431   :  { %v2969_v28 = vpop.f32.mrb[23].mxu0  ;;  %v1414_v34 = vadd.f32 1.0, %v3528_v33  ;;  %v1400_v38 = vadd.f32 %v3964_v50, %v1399_v8 }
 0x432   :  { %3529 = vrcp.f32 %v1407_v26 }
 0x433   :  { %3531 = vrcp.f32 %v1414_v34 }
 0x43c   :  { %v3530_v42 = vpop.eup %3529 }
 0x43d   :  { %v1417_v62 = vmul.f32 %v3530_v42, %v1400_v38  ;;  %v3532_v47 = vpop.eup %3531 }
 0x43e   :  { %v1420_v3 = vsub.f32 1.0, %v3532_v47  ;;  %v1422_v51 = vmul.f32 %v3532_v47, %v1189_v13 }
 0x43f   :  { %v1418_v12 = vadd.f32 %v1417_v62, %v3939_v14 }
 0x441   :  { %3533 = vtanh.f32 %v1418_v12 }
 0x44b   :  { %v3534_v9 = vpop.eup %3533 }
 0x44c   :  { %v1421_v48 = vmul.f32 %v3534_v9, %v1420_v3 }
 0x44e   :  { %v1423_v52 = vadd.f32 %v1422_v51, %v1421_v48 }
 0x450   :  { %2987 = vmatmul.mubr.msk.f32.vlgmr.msra.gmra.mrb[24].mxu1 %vm481_vm3, %v1423_v52  ;;  %3006 = vmatmul.mubr.msk.f32.vlgmr.msra.gmra.mrb[24].mxu0 %vm481_vm3, %v1423_v52 }
 0x451   :  { %3368 = vmatpush3.bf16.msra.mxu1 %v3863_v39  ;;  %3024 = vmatprep.mubr.msk.f32.mxu1 %vm3628_vm2, %v3629_v40 }
 0x452   :  { %3369 = vmatprep.subr.bf16.mxu1 %v3627_v16  ;;  %3380 = vmatpush3.bf16.msra.mxu0 %v3793_v17 }
 0x453   :  { %3381 = vmatprep.subr.bf16.mxu0 %v3627_v16  ;;  %3043 = vmatprep.mubr.msk.f32.mxu0 %vm3628_vm2, %v3629_v40 }
 0x455   :  { %3371 = vmatpush3.bf16.msra.mxu1 %v3874_v43 }
 0x456   :  { %3372 = vmatprep.subr.bf16.mxu1 %v3627_v16  ;;  %3383 = vmatpush3.bf16.msra.mxu0 %v3809_v23 }
 0x457   :  { %3384 = vmatprep.subr.bf16.mxu0 %v3627_v16 }
 0x459   :  { %3374 = vmatpush3.bf16.msra.mxu1 %v3884_v46 }
 0x45a   :  { %3375 = vmatprep.subr.bf16.mxu1 %v3627_v16  ;;  %3386 = vmatpush3.bf16.msra.mxu0 %v3827_v29 }
 0x45b   :  { %3387 = vmatprep.subr.bf16.mxu0 %v3627_v16 }
 0x45d   :  { %3377 = vmatpush3.bf16.msra.mxu1 %v3890_v49 }
 0x45e   :  { %3390 = vmatprep.subr.bf16.mxu1 %v3627_v16  ;;  %3389 = vmatpush3.bf16.msra.mxu0 %v3847_v35 }
 0x45f   :  { %3402 = vmatprep.subr.bf16.mxu0 %v3627_v16 }
 0x460   :  { %3025 = vmatmul.mubr.msk.f32.vlgmr.msra.gmra.mrb[26].mxu1 %vm481_vm3, %v1423_v52 }
 0x461   :  { %3392 = vmatpush3.bf16.msra.mxu1 %v3795_v18  ;;  %3062 = vmatprep.mubr.msk.f32.mxu1 %vm3628_vm2, %v3629_v40 }
 0x462   :  { %3393 = vmatprep.subr.bf16.mxu1 %v3627_v16 }
 0x465   :  { %3395 = vmatpush3.bf16.msra.mxu1 %v3811_v24 }
 0x466   :  { %3396 = vmatprep.subr.bf16.mxu1 %v3627_v16 }
 0x469   :  { %3398 = vmatpush3.bf16.msra.mxu1 %v3829_v30 }
 0x46a   :  { %3399 = vmatprep.subr.bf16.mxu1 %v3627_v16 }
 0x46d   :  { %3401 = vmatpush3.bf16.msra.mxu1 %v3849_v36 }
 0x46e   :  { %3414 = vmatprep.subr.bf16.mxu1 %v3627_v16 }
 0x523   :  { %v1493_v14 = vpop.f32.mrb[24].mxu1  ;;  %v1563_v54 = vpop.f32.mrb[24].mxu0 }
 0x524   :  { %v1637_v58 = vadd.f32 %v1493_v14, %v3917_v57  ;;  %v1644_v59 = vadd.f32 %v1563_v54, %v3949_v31  ;;  %v2988_v61 = vpop.f32.mrb[25].mxu1  ;;  %v3007_v2 = vpop.f32.mrb[25].mxu0 }
 0x526   :  { %v2438_v19 = vmul.f32 -1.442695, %v1637_v58  ;;  %v2439_v63 = vmul.f32 -1.442695, %v1644_v59 }
 0x528   :  { %3535 = vpow2.f32 %v2438_v19 }
 0x529   :  { %3537 = vpow2.f32 %v2439_v63 }
 0x532   :  { %v3536_v4 = vpop.eup %3535 }
 0x533   :  { %v1641_v5 = vadd.f32 1.0, %v3536_v4  ;;  %v1633_v10 = vpop.f32.mrb[26].mxu1  ;;  %v3538_v13 = vpop.eup %3537 }
 0x534   :  { %v3026_v11 = vpop.f32.mrb[27].mxu1  ;;  %v1648_v20 = vadd.f32 1.0, %v3538_v13  ;;  %v1634_v15 = vadd.f32 %v3964_v50, %v1633_v10 }
 0x535   :  { %3539 = vrcp.f32 %v1641_v5 }
 0x536   :  { %3541 = vrcp.f32 %v1648_v20 }
 0x53f   :  { %v3540_v55 = vpop.eup %3539 }
 0x540   :  { %v1651_v57 = vmul.f32 %v3540_v55, %v1634_v15  ;;  %v3542_v6 = vpop.eup %3541 }
 0x541   :  { %v1654_v56 = vsub.f32 1.0, %v3542_v6  ;;  %v1656_v21 = vmul.f32 %v3542_v6, %v1423_v52 }
 0x542   :  { %v1652_v31 = vadd.f32 %v1651_v57, %v3951_v32 }
 0x544   :  { %3543 = vtanh.f32 %v1652_v31 }
 0x54e   :  { %v3544_v1 = vpop.eup %3543 }
 0x54f   :  { %v1655_v7 = vmul.f32 %v3544_v1, %v1654_v56 }
 0x551   :  { %v1657_v22 = vadd.f32 %v1656_v21, %v1655_v7 }
 0x553   :  { %3044 = vmatmul.mubr.msk.f32.vlgmr.msra.gmra.mrb[26].mxu0 %vm481_vm3, %v1657_v22  ;;  %3063 = vmatmul.mubr.msk.f32.vlgmr.msra.gmra.mrb[28].mxu1 %vm481_vm3, %v1657_v22 }
 0x554   :  { %3404 = vmatpush3.bf16.msra.mxu0 %v3863_v39  ;;  %3081 = vmatprep.mubr.msk.f32.mxu0 %vm3628_vm2, %v3629_v40 }
 0x555   :  { %3405 = vmatprep.subr.bf16.mxu0 %v3627_v16  ;;  %3416 = vmatpush3.bf16.msra.mxu1 %v3793_v17 }
 0x556   :  { %3417 = vmatprep.subr.bf16.mxu1 %v3627_v16  ;;  %3100 = vmatprep.mubr.msk.f32.mxu1 %vm3628_vm2, %v3629_v40 }
 0x558   :  { %3407 = vmatpush3.bf16.msra.mxu0 %v3874_v43 }
 0x559   :  { %3408 = vmatprep.subr.bf16.mxu0 %v3627_v16  ;;  %3419 = vmatpush3.bf16.msra.mxu1 %v3809_v23 }
 0x55a   :  { %3420 = vmatprep.subr.bf16.mxu1 %v3627_v16 }
 0x55c   :  { %3410 = vmatpush3.bf16.msra.mxu0 %v3884_v46 }
 0x55d   :  { %3411 = vmatprep.subr.bf16.mxu0 %v3627_v16  ;;  %3422 = vmatpush3.bf16.msra.mxu1 %v3827_v29 }
 0x55e   :  { %3423 = vmatprep.subr.bf16.mxu1 %v3627_v16 }
 0x560   :  { %3413 = vmatpush3.bf16.msra.mxu0 %v3890_v49 }
 0x561   :  { %3426 = vmatprep.subr.bf16.mxu0 %v3627_v16  ;;  %3425 = vmatpush3.bf16.msra.mxu1 %v3847_v35 }
 0x562   :  { %3438 = vmatprep.subr.bf16.mxu1 %v3627_v16 }
 0x563   :  { %3082 = vmatmul.mubr.msk.f32.vlgmr.msra.gmra.mrb[28].mxu0 %vm481_vm3, %v1657_v22 }
 0x564   :  { %3428 = vmatpush3.bf16.msra.mxu0 %v3795_v18  ;;  %3119 = vmatprep.mubr.msk.f32.mxu0 %vm3628_vm2, %v3629_v40 }
 0x565   :  { %3429 = vmatprep.subr.bf16.mxu0 %v3627_v16 }
 0x568   :  { %3431 = vmatpush3.bf16.msra.mxu0 %v3811_v24 }
 0x569   :  { %3432 = vmatprep.subr.bf16.mxu0 %v3627_v16 }
 0x56c   :  { %3434 = vmatpush3.bf16.msra.mxu0 %v3829_v30 }
 0x56d   :  { %3435 = vmatprep.subr.bf16.mxu0 %v3627_v16 }
 0x570   :  { %3437 = vmatpush3.bf16.msra.mxu0 %v3849_v36 }
 0x571   :  { %3450 = vmatprep.subr.bf16.mxu0 %v3627_v16 }
 0x626   :  { %v1727_v32 = vpop.f32.mrb[26].mxu0  ;;  %v1797_v26 = vpop.f32.mrb[28].mxu1 }
 0x627   :  { %v1871_v8 = vadd.f32 %v1727_v32, %v3913_v53  ;;  %v1878_v28 = vadd.f32 %v1797_v26, %v3945_v25  ;;  %v3045_v33 = vpop.f32.mrb[27].mxu0  ;;  %v3064_v34 = vpop.f32.mrb[29].mxu1 }
 0x629   :  { %v2443_v38 = vmul.f32 -1.442695, %v1871_v8  ;;  %v2444_v42 = vmul.f32 -1.442695, %v1878_v28 }
 0x62b   :  { %3545 = vpow2.f32 %v2443_v38 }
 0x62c   :  { %3547 = vpow2.f32 %v2444_v42 }
 0x635   :  { %v3546_v62 = vpop.eup %3545 }
 0x636   :  { %v1875_v12 = vadd.f32 1.0, %v3546_v62  ;;  %v1867_v47 = vpop.f32.mrb[28].mxu0  ;;  %v3548_v9 = vpop.eup %3547 }
 0x637   :  { %v3083_v3 = vpop.f32.mrb[29].mxu0  ;;  %v1882_v48 = vadd.f32 1.0, %v3548_v9  ;;  %v1868_v51 = vadd.f32 %v3964_v50, %v1867_v47 }
 0x638   :  { %3549 = vrcp.f32 %v1875_v12  ;;  %v2455_v12 = vld [vmem:[%s4222_s11] ss:$0 sm:$0xff] }
 0x639   :  { %3551 = vrcp.f32 %v1882_v48 }
 0x642   :  { %v3550_v52 = vpop.eup %3549 }
 0x643   :  { %v1885_v53 = vmul.f32 %v3550_v52, %v1868_v51  ;;  %v3552_v14 = vpop.eup %3551 }
 0x644   :  { %v1888_v54 = vsub.f32 1.0, %v3552_v14  ;;  %v1890_v61 = vmul.f32 %v3552_v14, %v1657_v22 }
 0x645   :  { %v1886_v25 = vadd.f32 %v1885_v53, %v3947_v27 }
 0x647   :  { %3553 = vtanh.f32 %v1886_v25 }
 0x651   :  { %v3554_v58 = vpop.eup %3553 }
 0x652   :  { %v1889_v59 = vmul.f32 %v3554_v58, %v1888_v54 }
 0x654   :  { %v1891_v2 = vadd.f32 %v1890_v61, %v1889_v59 }
 0x656   :  { %3101 = vmatmul.mubr.msk.f32.vlgmr.msra.gmra.mrb[30].mxu1 %vm481_vm3, %v1891_v2  ;;  %3120 = vmatmul.mubr.msk.f32.vlgmr.msra.gmra.mrb[30].mxu0 %vm481_vm3, %v1891_v2 }
 0x657   :  { %3440 = vmatpush3.bf16.msra.mxu1 %v3863_v39  ;;  %3138 = vmatprep.mubr.msk.f32.mxu1 %vm3628_vm2, %v3629_v40 }
 0x658   :  { %3441 = vmatprep.subr.bf16.mxu1 %v3627_v16  ;;  %3452 = vmatpush3.bf16.msra.mxu0 %v3793_v17 }
 0x659   :  { %3453 = vmatprep.subr.bf16.mxu0 %v3627_v16  ;;  %3157 = vmatprep.mubr.msk.f32.mxu0 %vm3628_vm2, %v3629_v40 }
 0x65b   :  { %3443 = vmatpush3.bf16.msra.mxu1 %v3874_v43 }
 0x65c   :  { %3444 = vmatprep.subr.bf16.mxu1 %v3627_v16  ;;  %3455 = vmatpush3.bf16.msra.mxu0 %v3809_v23 }
 0x65d   :  { %3456 = vmatprep.subr.bf16.mxu0 %v3627_v16 }
 0x65f   :  { %3446 = vmatpush3.bf16.msra.mxu1 %v3884_v46 }
 0x660   :  { %3447 = vmatprep.subr.bf16.mxu1 %v3627_v16  ;;  %3458 = vmatpush3.bf16.msra.mxu0 %v3827_v29 }
 0x661   :  { %3459 = vmatprep.subr.bf16.mxu0 %v3627_v16 }
 0x663   :  { %3449 = vmatpush3.bf16.msra.mxu1 %v3890_v49 }
 0x664   :  { %3462 = vmatprep.subr.bf16.mxu1 %v3627_v16  ;;  %3461 = vmatpush3.bf16.msra.mxu0 %v3847_v35 }
 0x665   :  { %3474 = vmatprep.subr.bf16.mxu0 %v3627_v16 }
 0x666   :  { %3139 = vmatmul.mubr.msk.f32.vlgmr.msra.gmra.mrb[32].mxu1 %vm481_vm3, %v1891_v2 }
 0x667   :  { %3464 = vmatpush3.bf16.msra.mxu1 %v3795_v18  ;;  %3176 = vmatprep.mubr.msk.f32.mxu1 %vm3628_vm2, %v3629_v40 }
 0x668   :  { %3465 = vmatprep.subr.bf16.mxu1 %v3627_v16 }
 0x66b   :  { %3467 = vmatpush3.bf16.msra.mxu1 %v3811_v24 }
 0x66c   :  { %3468 = vmatprep.subr.bf16.mxu1 %v3627_v16 }
 0x66f   :  { %3470 = vmatpush3.bf16.msra.mxu1 %v3829_v30 }
 0x670   :  { %3471 = vmatprep.subr.bf16.mxu1 %v3627_v16 }
 0x673   :  { %3473 = vmatpush3.bf16.msra.mxu1 %v3849_v36 }
 0x729   :  { %v1961_v17 = vpop.f32.mrb[30].mxu1  ;;  %v2031_v23 = vpop.f32.mrb[30].mxu0 }
 0x72a   :  { %v2105_v29 = vadd.f32 %v1961_v17, %v3923_v0  ;;  %v2112_v18 = vadd.f32 %v2031_v23, %v3957_v44  ;;  %v3102_v35 = vpop.f32.mrb[31].mxu1  ;;  %v3121_v27 = vpop.f32.mrb[31].mxu0 }
 0x72c   :  { %v2448_v19 = vmul.f32 -1.442695, %v2105_v29  ;;  %v2449_v63 = vmul.f32 -1.442695, %v2112_v18 }
 0x72e   :  { %3555 = vpow2.f32 %v2448_v19 }
 0x72f   :  { %3557 = vpow2.f32 %v2449_v63 }
 0x738   :  { %v3556_v24 = vpop.eup %3555 }
 0x739   :  { %v2109_v4 = vadd.f32 1.0, %v3556_v24  ;;  %v2101_v5 = vpop.f32.mrb[32].mxu1  ;;  %v3558_v10 = vpop.eup %3557 }
 0x73a   :  { %v3140_v30 = vpop.f32.mrb[33].mxu1  ;;  %v2116_v11 = vadd.f32 1.0, %v3558_v10  ;;  %v2102_v36 = vadd.f32 %v3964_v50, %v2101_v5 }
 0x73b   :  { %3559 = vrcp.f32 %v2109_v4 }
 0x73c   :  { %3561 = vrcp.f32 %v2116_v11 }
 0x745   :  { %v3560_v13 = vpop.eup %3559 }
 0x746   :  { %v2119_v0 = vmul.f32 %v3560_v13, %v2102_v36  ;;  %v3562_v20 = vpop.eup %3561 }
 0x747   :  { %v2122_v15 = vsub.f32 1.0, %v3562_v20  ;;  %v2124_v31 = vmul.f32 %v3562_v20, %v1891_v2 }
 0x748   :  { %v2120_v44 = vadd.f32 %v2119_v0, %v3959_v45 }
 0x74a   :  { %3563 = vtanh.f32 %v2120_v44 }
 0x754   :  { %v3564_v55 = vpop.eup %3563 }
 0x755   :  { %v2123_v57 = vmul.f32 %v3564_v55, %v2122_v15 }
 0x757   :  { %v2125_v6 = vadd.f32 %v2124_v31, %v2123_v57 }
 0x759   :  { %3158 = vmatmul.mubr.msk.f32.vlgmr.msra.gmra.mrb[32].mxu0 %vm481_vm3, %v2125_v6  ;;  %3177 = vmatmul.mubr.msk.f32.vlgmr.msra.gmra.mrb[34].mxu1 %vm481_vm3, %v2125_v6 }
 0x75a   :  { %3476 = vmatpush3.bf16.msra.mxu0 %v3863_v39  ;;  %3195 = vmatprep.mubr.msk.f32.mxu0 %vm3628_vm2, %v3629_v40 }
 0x75b   :  { %3477 = vmatprep.subr.bf16.mxu0 %v3627_v16 }
 0x75e   :  { %3479 = vmatpush3.bf16.msra.mxu0 %v3874_v43 }
 0x75f   :  { %3480 = vmatprep.subr.bf16.mxu0 %v3627_v16 }
 0x762   :  { %3482 = vmatpush3.bf16.msra.mxu0 %v3884_v46 }
 0x763   :  { %3483 = vmatprep.subr.bf16.mxu0 %v3627_v16 }
 0x766   :  { %3485 = vmatpush3.bf16.msra.mxu0 %v3890_v49 }
 0x769   :  { %3196 = vmatmul.mubr.msk.f32.vlgmr.msra.gmra.mrb[34].mxu0 %vm481_vm3, %v2125_v6 }
 0x82c   :  { %v2195_v45 = vpop.f32.mrb[32].mxu0  ;;  %v2265_v56 = vpop.f32.mrb[34].mxu1 }
 0x82d   :  { %v2339_v39 = vadd.f32 %v2195_v45, %v3919_v60  ;;  %v2346_v40 = vadd.f32 %v2265_v56, %v3953_v37  ;;  %v3159_v1 = vpop.f32.mrb[33].mxu0  ;;  %v3178_v7 = vpop.f32.mrb[35].mxu1 }
 0x82f   :  { %v2453_v21 = vmul.f32 -1.442695, %v2339_v39  ;;  %v2454_v43 = vmul.f32 -1.442695, %v2346_v40 }
 0x831   :  { %3565 = vpow2.f32 %v2453_v21 }
 0x832   :  { %3567 = vpow2.f32 %v2454_v43 }
 0x83b   :  { %v3566_v22 = vpop.eup %3565 }
 0x83c   :  { %v2343_v46 = vadd.f32 1.0, %v3566_v22  ;;  %v2335_v32 = vpop.f32.mrb[34].mxu0  ;;  %v3568_v49 = vpop.eup %3567 }
 0x83d   :  { %v3197_v16 = vpop.f32.mrb[35].mxu0  ;;  %v2350_v26 = vadd.f32 1.0, %v3568_v49  ;;  %v2336_v8 = vadd.f32 %v3964_v50, %v2335_v32  ;;  %v2456_v50 = vld [vmem:[#allocation2] ss:$0 sm:$0xff] }
 0x83e   :  { %3569 = vrcp.f32 %v2343_v46 }
 0x83f   :  { %3571 = vrcp.f32 %v2350_v26 }
 0x848   :  { %v3570_v28 = vpop.eup %3569 }
 0x849   :  { %v2353_v60 = vmul.f32 %v3570_v28, %v2336_v8  ;;  %v3572_v33 = vpop.eup %3571 }
 0x84a   :  { %v2356_v34 = vsub.f32 1.0, %v3572_v33  ;;  %v2358_v62 = vmul.f32 %v3572_v33, %v2125_v6 }
 0x84b   :  { %v2354_v37 = vadd.f32 %v2353_v60, %v3955_v41 }
 0x84d   :  { %3573 = vtanh.f32 %v2354_v37 }
 0x857   :  { %v3574_v38 = vpop.eup %3573 }
 0x858   :  { %v2357_v42 = vmul.f32 %v3574_v38, %v2356_v34 }
 0x85a   :  { %v2359_v47 = vadd.f32 %v2358_v62, %v2357_v42 }
 0x85c   :  { %v2367_v3 = vmul.f32 %v2455_v12, %v2359_v47 }
 0x85e   :  { %v2368_v9 = vsel %vm481_vm3, %v2367_v3, 0.0 }
 0x85f   :  { %2369 = vadd.xlane.f32.xlu0 %v2368_v9 }
 0x8ec   :  { %v2370_v48 = vpop.xlane.xlu0 %2369 }
 0x8ed   :  { %v2378_v51 = vadd.f32 %v2456_v50, %v2370_v48 }
 0x8ef   :  { %2380 = vst.msk [vmem:[%s4224_s13] sm:$0xff] %vm2379_vm4, %v2378_v51 }
 0x8f0   :  { %2385 = vsyncpa [#allocation4], 1 }
 0x8f1   :  { %2386 = vsyncpa [#allocation6], 1 }

</bundles_post_ra>
